<compile_context>
chip_gen: v6e
topology: v6e:2x2x1
jax: 0.10.0
libtpu: 0.0.40
codegen_flags: <defaults>
</compile_context>

<pallas_src>
import jax
import jax.numpy as jnp
from jax import lax
from jax.experimental import pallas as pl
from jax.experimental.pallas import tpu as pltpu


def _round_up(x, m):
    return ((x + m - 1) // m) * m


# ---------------------------------------------------------------------------
# Exact (erf) GELU, matching torch.nn.GELU() default.
# Abramowitz & Stegun 7.1.26 polynomial (|err| < 1.5e-7), built only from
# Pallas-supported elementwise ops; the divide is an EUP approximate reciprocal.
# ---------------------------------------------------------------------------
_ERF_A1 = 0.254829592
_ERF_A2 = -0.284496736
_ERF_A3 = 1.421413741
_ERF_A4 = -1.453152027
_ERF_A5 = 1.061405429
_ERF_P = 0.3275911
_INV_SQRT2 = 0.7071067811865476


def _erf(x):
    ax = jnp.abs(x)
    t = pl.reciprocal(1.0 + _ERF_P * ax, approx=True)   # EUP slot, not VALU divide
    poly = t * (_ERF_A1 + t * (_ERF_A2 + t * (_ERF_A3 + t * (_ERF_A4 + t * _ERF_A5))))
    y = 1.0 - poly * jnp.exp(-ax * ax)
    return jnp.where(x >= 0, y, -y)


def _gelu_exact(x):
    return 0.5 * x * (1.0 + _erf(x * _INV_SQRT2))


# ---------------------------------------------------------------------------
# Kernels
# ---------------------------------------------------------------------------
def _ffn_kernel_resident(x_ref, w1_ref, b1_ref, w2_ref, b2_ref, o_ref):
    # Full weights resident in VMEM; single pass per row tile.
    h = jnp.dot(x_ref[...], w1_ref[...], preferred_element_type=jnp.float32)
    h = _gelu_exact(h + b1_ref[...].astype(jnp.float32))
    out = jnp.dot(h.astype(w2_ref.dtype), w2_ref[...],
                  preferred_element_type=jnp.float32)
    o_ref[...] = (out + b2_ref[...].astype(jnp.float32)).astype(o_ref.dtype)


def _ffn_kernel_streamed(x_ref, w1_ref, b1_ref, w2_ref, b2_ref, o_ref, acc_ref):
    # Hidden dim streamed in (Dp, tile_h)/(tile_h, Dp) weight blocks; f32
    # accumulator resident across the trailing "arbitrary" grid axis.
    k = pl.program_id(1)

    @pl.when(k == 0)
    def _init():
        acc_ref[...] = jnp.zeros_like(acc_ref)

    h = jnp.dot(x_ref[...], w1_ref[...], preferred_element_type=jnp.float32)
    h = _gelu_exact(h + b1_ref[...].astype(jnp.float32))
    acc_ref[...] += jnp.dot(h.astype(w2_ref.dtype), w2_ref[...],
                            preferred_element_type=jnp.float32)

    @pl.when(k == pl.num_programs(1) - 1)
    def _finish():
        o_ref[...] = (acc_ref[...] + b2_ref[...].astype(jnp.float32)
                      ).astype(o_ref.dtype)


# ---------------------------------------------------------------------------
# Tile selection helpers
# ---------------------------------------------------------------------------
def _default_tile_m_target():
    # v5e ridge ~240 flops/byte, v6e ~680, v7x ~320 (weight-streamed regime).
    try:
        kind = jax.devices()[0].device_kind.lower()
    except Exception:
        return 512
    if "v5 lite" in kind or "v5e" in kind or "v5litepod" in kind:
        return 256
    if "v6" in kind:
        return 1024
    return 512


def _vmem_estimate(tile_m, tile_h, Dp, x_bytes, w_bytes, o_bytes, streamed):
    x_t = tile_m * Dp * x_bytes
    o_t = tile_m * Dp * o_bytes
    w1_b = Dp * tile_h * w_bytes
    w2_b = tile_h * Dp * w_bytes
    b_b = (tile_h + Dp) * 4
    io = 2 * (x_t + o_t + w1_b + w2_b + b_b)      # double-buffered pipelining
    acc = tile_m * Dp * 4 if streamed else 0      # f32 accumulator scratch
    h = tile_m * tile_h * 4                       # f32 GELU intermediate
    return io + acc + 3 * h                       # margin for elementwise temps


# ---------------------------------------------------------------------------
# Public wrapper
# ---------------------------------------------------------------------------
def feed_forward(x, w1, b1, w2, b2, *, tile_m=None, tile_h=512,
                 compute_dtype=None, weight_resident=None,
                 vmem_limit_bytes=40 * 1024 * 1024):
    """FeedForward: GELU(x @ W1 + b1) @ W2 + b2.

    x:  (..., D)
    w1: (D, H)   (torch Linear weight transposed to (in, out))
    b1: (H,)
    w2: (H, D)
    b2: (D,)
    compute_dtype: optional matmul dtype (e.g. jnp.bfloat16) for the native MXU
        path; output keeps x's original dtype, accumulation is always f32.
    """
    *lead, D = x.shape
    H = w1.shape[1]
    assert w1.shape == (D, H) and w2.shape == (H, D)
    assert b1.shape == (H,) and b2.shape == (D,)

    out_dtype = x.dtype
    if compute_dtype is not None:
        x = x.astype(compute_dtype)
        w1 = w1.astype(compute_dtype)
        w2 = w2.astype(compute_dtype)

    rows = 1
    for s in lead:
        rows *= s
    x2 = x.reshape(rows, D)

    x_bytes = jnp.dtype(x.dtype).itemsize
    w_bytes = jnp.dtype(w1.dtype).itemsize
    o_bytes = jnp.dtype(out_dtype).itemsize

    # Lane-dense channel dims (multiples of 128).
    Dp = _round_up(D, 128)
    Hp = _round_up(H, 128)

    # Row tile: generation-aware target, adapted to the actual row count.
    if tile_m is None:
        tile_m = _default_tile_m_target()
    if rows >= 256:
        tile_m = min(tile_m, _round_up(rows, 256))
    else:
        tile_m = min(max(tile_m, 16), _round_up(rows, 16))
    tile_m = max(16, (tile_m // 16) * 16)

    budget = int(vmem_limit_bytes * 0.85)

    def fits(th, streamed):
        return _vmem_estimate(tile_m, th, Dp, x_bytes, w_bytes, o_bytes,
                              streamed) <= budget

    if weight_resident is None:
        resident = fits(Hp, streamed=False)
    else:
        resident = bool(weight_resident)

    if resident:
        tile_h = Hp
    else:
        tile_h = min(max(tile_h, 128), Hp)
        tile_h = (tile_h // 128) * 128
        while tile_h > 128 and not fits(tile_h, True):
            tile_h = max(128, ((tile_h // 2) // 128) * 128)
        while tile_m > 16 and not fits(tile_h, True):
            tile_m = max(16, ((tile_m // 2) // 16) * 16)
        Hp = _round_up(Hp, tile_h)

    rows_p = _round_up(rows, tile_m)
    n_row_tiles = rows_p // tile_m

    # --- Padding (skipped entirely when shapes are already aligned) ---------
    if rows_p == rows and Dp == D:
        xp = x2
    else:
        xp = jnp.zeros((rows_p, Dp), x2.dtype).at[:rows, :D].set(x2)
    # TODO(synk): for repeated calls, pre-pad W1/W2/b1/b2 once at parameter-prep
    # time (the skip below already avoids the copy when shapes are aligned).
    if Dp == D and Hp == H:
        w1p, w2p = w1, w2
        b1p = b1.reshape(1, H)
        b2p = b2.reshape(1, D)
    else:
        w1p = jnp.zeros((Dp, Hp), w1.dtype).at[:D, :H].set(w1)
        w2p = jnp.zeros((Hp, Dp), w2.dtype).at[:H, :D].set(w2)
        b1p = jnp.zeros((1, Hp), b1.dtype).at[0, :H].set(b1)
        b2p = jnp.zeros((1, Dp), b2.dtype).at[0, :D].set(b2)

    if resident:
        out_p = pl.pallas_call(
            _ffn_kernel_resident,
            out_shape=jax.ShapeDtypeStruct((rows_p, Dp), out_dtype),
            grid_spec=pltpu.PrefetchScalarGridSpec(
                num_scalar_prefetch=0,
                grid=(n_row_tiles,),
                in_specs=[
                    pl.BlockSpec((tile_m, Dp), lambda i: (i, 0)),   # x row tile
                    pl.BlockSpec((Dp, Hp), lambda i: (0, 0)),       # W1 (resident)
                    pl.BlockSpec((1, Hp), lambda i: (0, 0)),        # b1
                    pl.BlockSpec((Hp, Dp), lambda i: (0, 0)),       # W2 (resident)
                    pl.BlockSpec((1, Dp), lambda i: (0, 0)),        # b2
                ],
                out_specs=pl.BlockSpec((tile_m, Dp), lambda i: (i, 0)),
            ),
            compiler_params=pltpu.CompilerParams(
                dimension_semantics=("parallel",),
                vmem_limit_bytes=vmem_limit_bytes,
            ),
        )(xp, w1p, b1p, w2p, b2p)
    else:
        grid = (n_row_tiles, Hp // tile_h)
        out_p = pl.pallas_call(
            _ffn_kernel_streamed,
            out_shape=jax.ShapeDtypeStruct((rows_p, Dp), out_dtype),
            grid_spec=pltpu.PrefetchScalarGridSpec(
                num_scalar_prefetch=0,
                grid=grid,
                in_specs=[
                    pl.BlockSpec((tile_m, Dp), lambda i, k: (i, 0)),   # x row tile
                    pl.BlockSpec((Dp, tile_h), lambda i, k: (0, k)),   # W1 block
                    pl.BlockSpec((1, tile_h), lambda i, k: (0, k)),    # b1 block
                    pl.BlockSpec((tile_h, Dp), lambda i, k: (k, 0)),   # W2 block
                    pl.BlockSpec((1, Dp), lambda i, k: (0, 0)),        # b2
                ],
                out_specs=pl.BlockSpec((tile_m, Dp), lambda i, k: (i, 0)),
                scratch_shapes=[pltpu.VMEM((tile_m, Dp), jnp.float32)],
            ),
            compiler_params=pltpu.CompilerParams(
                dimension_semantics=("parallel", "arbitrary"),
                vmem_limit_bytes=vmem_limit_bytes,
            ),
        )(xp, w1p, b1p, w2p, b2p)

    if rows_p == rows and Dp == D:
        out2 = out_p
    else:
        out2 = out_p[:rows, :D]
    return out2.reshape(*lead, D)


def _reference(x, w1, b1, w2, b2):
    xf = x.astype(jnp.float32)
    h = jnp.dot(xf, w1.astype(jnp.float32), precision=lax.Precision.HIGHEST) + b1
    h = 0.5 * h * (1.0 + jax.scipy.special.erf(h / jnp.sqrt(2.0).astype(jnp.float32)))
    out = jnp.dot(h, w2.astype(jnp.float32), precision=lax.Precision.HIGHEST) + b2
    return out.astype(x.dtype)


if __name__ == "__main__":
    key = jax.random.PRNGKey(0)
    B, N, dim, hidden = 2, 64, 64, 256   # small shapes; exercises D padding 64->128

    k_x, k_w1, k_b1, k_w2, k_b2 = jax.random.split(key, 5)
    x = jax.random.normal(k_x, (B, N, dim), dtype=jnp.float32)
    w1 = jax.random.normal(k_w1, (dim, hidden), dtype=jnp.float32) / jnp.sqrt(dim)
    b1 = jax.random.normal(k_b1, (hidden,), dtype=jnp.float32) * 0.01
    w2 = jax.random.normal(k_w2, (hidden, dim), dtype=jnp.float32) / jnp.sqrt(hidden)
    b2 = jax.random.normal(k_b2, (dim,), dtype=jnp.float32) * 0.01

    ref = _reference(x, w1, b1, w2, b2)

    # 1) Default path (f32 in -> f32 compute; resident weights for this tiny layer).
    out = jax.block_until_ready(feed_forward(x, w1, b1, w2, b2))
    assert out.shape == (B, N, dim)
    err = jnp.max(jnp.abs(out - ref))
    assert jnp.allclose(out, ref, atol=3e-3, rtol=3e-3), f"f32 mismatch: {err}"

    # 2) Hidden-dim streamed path (forced) — same numerics, different pipeline.
    out_s = jax.block_until_ready(
        feed_forward(x, w1, b1, w2, b2, weight_resident=False, tile_h=128))
    err_s = jnp.max(jnp.abs(out_s - ref))
    assert jnp.allclose(out_s, ref, atol=3e-3, rtol=3e-3), f"streamed mismatch: {err_s}"

    # 3) bf16 fast path (native MXU dtype, f32 accumulation) — looser tolerance.
    out_bf = jax.block_until_ready(
        feed_forward(x, w1, b1, w2, b2, compute_dtype=jnp.bfloat16))
    err_bf = jnp.max(jnp.abs(out_bf - ref))
    assert jnp.allclose(out_bf, ref, atol=1.5e-1, rtol=1e-1), f"bf16 mismatch: {err_bf}"

    print("KERNEL_OK")
</pallas_src>

<mosaic_0001>
module attributes {stable_mosaic.version = 11 : i64} {
  func.func @_ffn_kernel_resident(%arg0: i32, %arg1: memref<128x128xf32, #tpu.memory_space<vmem>>, %arg2: memref<128x256xf32, #tpu.memory_space<vmem>>, %arg3: memref<1x256xf32, #tpu.memory_space<vmem>>, %arg4: memref<256x128xf32, #tpu.memory_space<vmem>>, %arg5: memref<1x128xf32, #tpu.memory_space<vmem>>, %arg6: memref<128x128xf32, #tpu.memory_space<vmem>>) attributes {dimension_semantics = [#tpu.dimension_semantics<parallel>], iteration_bounds = array<i64: 1>, scalar_prefetch = 0 : i64, scratch_operands = 0 : i64, tpu.core_type = #tpu.core_type<tc>, window_params = [{transform_indices = @transform_0, window_bounds = array<i64: 128, 128>}, {pipeline_mode = #tpu.pipeline_mode<synchronous>, transform_indices = @transform_1, window_bounds = array<i64: 128, 256>}, {pipeline_mode = #tpu.pipeline_mode<synchronous>, transform_indices = @transform_2, window_bounds = array<i64: 1, 256>}, {pipeline_mode = #tpu.pipeline_mode<synchronous>, transform_indices = @transform_3, window_bounds = array<i64: 256, 128>}, {pipeline_mode = #tpu.pipeline_mode<synchronous>, transform_indices = @transform_4, window_bounds = array<i64: 1, 128>}, {transform_indices = @transform_5, window_bounds = array<i64: 128, 128>}]} {
    %c0 = arith.constant 0 : index
    %c0_0 = arith.constant 0 : index
    %0 = vector.load %arg1[%c0, %c0_0] : memref<128x128xf32, #tpu.memory_space<vmem>>, vector<128x128xf32>
    %c0_1 = arith.constant 0 : index
    %c0_2 = arith.constant 0 : index
    %1 = vector.load %arg2[%c0_1, %c0_2] : memref<128x256xf32, #tpu.memory_space<vmem>>, vector<128x256xf32>
    %cst = arith.constant dense<0.000000e+00> : vector<128x256xf32>
    %2 = tpu.matmul %0, %1, %cst {dimension_numbers = #tpu.dot_dimension_numbers<[1], [0], [0], [1], [0, 0, 1, 1], [], []>} : vector<128x128xf32>, vector<128x256xf32>, vector<128x256xf32> -> vector<128x256xf32>
    %c0_3 = arith.constant 0 : index
    %c0_4 = arith.constant 0 : index
    %3 = vector.load %arg3[%c0_3, %c0_4] : memref<1x256xf32, #tpu.memory_space<vmem>>, vector<1x256xf32>
    %4 = vector.broadcast %3 : vector<1x256xf32> to vector<128x256xf32>
    %5 = arith.addf %2, %4 : vector<128x256xf32>
    %cst_5 = arith.constant 5.000000e-01 : f32
    %6 = vector.broadcast %cst_5 : f32 to vector<128x256xf32>
    %7 = arith.mulf %6, %5 : vector<128x256xf32>
    %cst_6 = arith.constant 0.707106769 : f32
    %8 = vector.broadcast %cst_6 : f32 to vector<128x256xf32>
    %9 = arith.mulf %5, %8 : vector<128x256xf32>
    %10 = math.absf %9 : vector<128x256xf32>
    %cst_7 = arith.constant 0.327591091 : f32
    %11 = vector.broadcast %cst_7 : f32 to vector<128x256xf32>
    %12 = arith.mulf %11, %10 : vector<128x256xf32>
    %cst_8 = arith.constant 1.000000e+00 : f32
    %13 = vector.broadcast %cst_8 : f32 to vector<128x256xf32>
    %14 = arith.addf %13, %12 : vector<128x256xf32>
    %15 = tpu.reciprocal %14 {approx = true} : vector<128x256xf32> -> vector<128x256xf32>
    %cst_9 = arith.constant 1.06140542 : f32
    %16 = vector.broadcast %cst_9 : f32 to vector<128x256xf32>
    %17 = arith.mulf %15, %16 : vector<128x256xf32>
    %cst_10 = arith.constant -1.45315206 : f32
    %18 = vector.broadcast %cst_10 : f32 to vector<128x256xf32>
    %19 = arith.addf %18, %17 : vector<128x256xf32>
    %20 = arith.mulf %15, %19 : vector<128x256xf32>
    %cst_11 = arith.constant 1.42141378 : f32
    %21 = vector.broadcast %cst_11 : f32 to vector<128x256xf32>
    %22 = arith.addf %21, %20 : vector<128x256xf32>
    %23 = arith.mulf %15, %22 : vector<128x256xf32>
    %cst_12 = arith.constant -0.284496725 : f32
    %24 = vector.broadcast %cst_12 : f32 to vector<128x256xf32>
    %25 = arith.addf %24, %23 : vector<128x256xf32>
    %26 = arith.mulf %15, %25 : vector<128x256xf32>
    %cst_13 = arith.constant 0.254829586 : f32
    %27 = vector.broadcast %cst_13 : f32 to vector<128x256xf32>
    %28 = arith.addf %27, %26 : vector<128x256xf32>
    %29 = arith.mulf %15, %28 : vector<128x256xf32>
    %cst_14 = arith.constant 0.000000e+00 : f32
    %30 = vector.broadcast %cst_14 : f32 to vector<128x256xf32>
    %31 = arith.subf %30, %10 : vector<128x256xf32>
    %32 = arith.mulf %31, %10 : vector<128x256xf32>
    %33 = math.exp %32 : vector<128x256xf32>
    %34 = arith.mulf %29, %33 : vector<128x256xf32>
    %cst_15 = arith.constant 1.000000e+00 : f32
    %35 = vector.broadcast %cst_15 : f32 to vector<128x256xf32>
    %36 = arith.subf %35, %34 : vector<128x256xf32>
    %cst_16 = arith.constant 0.000000e+00 : f32
    %37 = vector.broadcast %cst_16 : f32 to vector<128x256xf32>
    %38 = arith.cmpf oge, %9, %37 : vector<128x256xf32>
    %cst_17 = arith.constant 0.000000e+00 : f32
    %39 = vector.broadcast %cst_17 : f32 to vector<128x256xf32>
    %40 = arith.subf %39, %36 : vector<128x256xf32>
    %41 = arith.select %38, %36, %40 : vector<128x256xi1>, vector<128x256xf32>
    %cst_18 = arith.constant 1.000000e+00 : f32
    %42 = vector.broadcast %cst_18 : f32 to vector<128x256xf32>
    %43 = arith.addf %42, %41 : vector<128x256xf32>
    %44 = arith.mulf %7, %43 : vector<128x256xf32>
    %c0_19 = arith.constant 0 : index
    %c0_20 = arith.constant 0 : index
    %45 = vector.load %arg4[%c0_19, %c0_20] : memref<256x128xf32, #tpu.memory_space<vmem>>, vector<256x128xf32>
    %cst_21 = arith.constant dense<0.000000e+00> : vector<128x128xf32>
    %46 = tpu.matmul %44, %45, %cst_21 {dimension_numbers = #tpu.dot_dimension_numbers<[1], [0], [0], [1], [0, 0, 1, 1], [], []>} : vector<128x256xf32>, vector<256x128xf32>, vector<128x128xf32> -> vector<128x128xf32>
    %c0_22 = arith.constant 0 : index
    %c0_23 = arith.constant 0 : index
    %47 = vector.load %arg5[%c0_22, %c0_23] : memref<1x128xf32, #tpu.memory_space<vmem>>, vector<1x128xf32>
    %48 = vector.broadcast %47 : vector<1x128xf32> to vector<128x128xf32>
    %49 = arith.addf %46, %48 : vector<128x128xf32>
    %c0_24 = arith.constant 0 : index
    %c0_25 = arith.constant 0 : index
    %50 = vector.load %arg6[%c0_24, %c0_25] : memref<128x128xf32, #tpu.memory_space<vmem>>, vector<128x128xf32>
    tpu.vector_store %arg6[%c0_24, %c0_25], %49 {strides = array<i32>} : memref<128x128xf32, #tpu.memory_space<vmem>>, vector<128x128xf32>,
    return
  }
  func.func @transform_0(%arg0: i32) -> (i32, i32) {
    %c0_i32 = arith.constant 0 : i32
    %c0_i32_0 = arith.constant 0 : i32
    return %arg0, %c0_i32 : i32, i32
  }
  func.func @transform_1(%arg0: i32) -> (i32, i32) {
    %c0_i32 = arith.constant 0 : i32
    %c0_i32_0 = arith.constant 0 : i32
    %c0_i32_1 = arith.constant 0 : i32
    return %c0_i32, %c0_i32_0 : i32, i32
  }
  func.func @transform_2(%arg0: i32) -> (i32, i32) {
    %c0_i32 = arith.constant 0 : i32
    %c0_i32_0 = arith.constant 0 : i32
    %c0_i32_1 = arith.constant 0 : i32
    return %c0_i32, %c0_i32_0 : i32, i32
  }
  func.func @transform_3(%arg0: i32) -> (i32, i32) {
    %c0_i32 = arith.constant 0 : i32
    %c0_i32_0 = arith.constant 0 : i32
    %c0_i32_1 = arith.constant 0 : i32
    return %c0_i32, %c0_i32_0 : i32, i32
  }
  func.func @transform_4(%arg0: i32) -> (i32, i32) {
    %c0_i32 = arith.constant 0 : i32
    %c0_i32_0 = arith.constant 0 : i32
    %c0_i32_1 = arith.constant 0 : i32
    return %c0_i32, %c0_i32_0 : i32, i32
  }
  func.func @transform_5(%arg0: i32) -> (i32, i32) {
    %c0_i32 = arith.constant 0 : i32
    %c0_i32_0 = arith.constant 0 : i32
    return %arg0, %c0_i32 : i32, i32
  }
}

</mosaic_0001>

<bundles_post_ra>
// kernel: tpu_custom_call.1
= control target key start
LH: loop header
LB: loop body
LE: loop exit
PB: predicated region body
PF: predicated region fallthrough
CT: control target
= control target key end

     0   :  { %10 = vsyncpa [#allocation3], 0  ;;  %s2505_s0 = inlined_call_operand.hbm [shape: f32[128,128], index: 0, kind: input, shape index: {}]   ;;  %s2506_s1 = inlined_call_operand.hbm [shape: f32[128,256], index: 1, kind: input, shape index: {}]   ;;  %s2507_s2 = inlined_call_operand.vmem [shape: f32[1,256], index: 2, kind: input, shape index: {}]   ;;  %s2508_s3 = inlined_call_operand.hbm [shape: f32[256,128], index: 3, kind: input, shape index: {}]   ;;  %s2509_s4 = inlined_call_operand.vmem [shape: f32[1,128], index: 4, kind: input, shape index: {}]   ;;  %s2510_s5 = inlined_call_operand.hbm [shape: f32[128,128], index: 5, kind: output, shape index: {}]  }
   0x1   :  { %11 = vsyncpa [#allocation6], 0 }
   0x2   :  { %12 = vsyncpa [#allocation4], 0  ;;  %s1637_s18 = smov [#allocation5]  }
   0x3   :  { %s30_s19 = sshll.u32 %s1637_s18, 4  ;;  %s31_s19 = int_to_ptr.vmem [resolvable:$true] %s30_s19 }
   0x4   :  { %s1559_s20 = scalar_lea.vmem %s31_s19, 4096  ;;  %p1564_p1 = scmp.lt.s32.totalorder %s31_s19, %s31_s19 }
   0x5   :  { %p1560_p0 = scmp.ne.s32.totalorder %s31_s19, %s1559_s20  ;;  %p1565_p2 = scmp.lt.s32.totalorder %s1559_s20, %s1559_s20 }
   0x7   :  { %p1566_p3 = por %p1565_p2, %p1564_p1 }
   0x9   :  { %p1567_p4 = pnand %p1566_p3, %p1560_p0 }
   0xb   :  { %1570 = shalt.err (!%p1567_p4)
}
   0xc   :  { %s1638_s21 = smov 256   ;;  %s1639_s22 = smov 16  }
   0xd   :  { %36 = dma.hbm_to_vmem [thread:$0]  %s2506_s1, 4096, %s31_s19, [#allocation6], %s1638_s21, %s1638_s21, %s1639_s22  }
   0xe   :  { %s1640_s25 = smov [#allocation2]  }
   0xf   :  { %s18_s26 = sshll.u32 %s1640_s25, 4  ;;  %s19_s26 = int_to_ptr.vmem [resolvable:$true] %s18_s26 }
  0x10   :  { %s1579_s27 = scalar_lea.vmem %s19_s26, 2048  ;;  %p1584_p6 = scmp.lt.s32.totalorder %s19_s26, %s19_s26 }
  0x11   :  { %p1580_p5 = scmp.ne.s32.totalorder %s19_s26, %s1579_s27  ;;  %p1585_p7 = scmp.lt.s32.totalorder %s1579_s27, %s1579_s27 }
  0x13   :  { %p1586_p8 = por %p1585_p7, %p1584_p6 }
  0x15   :  { %p1587_p9 = pnand %p1586_p8, %p1580_p5 }
  0x17   :  { %1590 = shalt.err (!%p1587_p9)
}
  0x18   :  { %s1641_s28 = smov 128   ;;  %s1642_s29 = smov 8  }
  0x19   :  { %24 = dma.hbm_to_vmem [thread:$0]  %s2505_s0, 2048, %s19_s26, [#allocation3], %s1641_s28, %s1641_s28, %s1642_s29  }
  0x1a   :  { %s1643_s1 = smov [#allocation7]  }
  0x1b   :  { %s44_s7 = sshll.u32 %s1643_s1, 4  ;;  %s45_s7 = int_to_ptr.vmem [resolvable:$true] %s44_s7 }
  0x1c   :  { %s1599_s8 = scalar_lea.vmem %s45_s7, 4096  ;;  %p1604_p11 = scmp.lt.s32.totalorder %s45_s7, %s45_s7 }
  0x1d   :  { %p1600_p10 = scmp.ne.s32.totalorder %s45_s7, %s1599_s8  ;;  %p1605_p12 = scmp.lt.s32.totalorder %s1599_s8, %s1599_s8 }
  0x1f   :  { %p1606_p13 = por %p1605_p12, %p1604_p11 }
  0x21   :  { %p1607_p0 = pnand %p1606_p13, %p1600_p10 }
  0x23   :  { %1610 = shalt.err (!%p1607_p0)
}
  0x24   :  { %50 = dma.hbm_to_vmem [thread:$0]  %s2508_s3, 4096, %s45_s7, [#allocation6], %s1641_s28, %s1641_s28, %s1642_s29  }
  0x25   :  { %1631 = dma.done.wait [#allocation3], 2048  }
  0x26   :  { %1632 = vsyncadd [#allocation3], 4294965248 }
  0x27   :  { %1633 = dma.done.wait [#allocation6], 8192  }
  0x28   :  { %1634 = vsyncadd [#allocation6], 4294959104  ;;  %v1644_v0 = vmov 0.0   ;;  %v109_v1 = vld [vmem:[#allocation5 + $0xf8] sm:$0xff]  ;;  %v108_v2 = vld [vmem:[#allocation5 + $0xf0] sm:$0xff] }
  0x29   :  { %186 = vmatprep.mubr.f32.mxu0 %v1644_v0  ;;  %v107_v3 = vld [vmem:[#allocation5 + $0xe8] sm:$0xff]  ;;  %122 = vmatprep.subr.mxu0 %v109_v1  ;;  %v106_v4 = vld [vmem:[#allocation5 + $0xe0] sm:$0xff]  ;;  %v105_v5 = vld [vmem:[#allocation5 + $0xd8] sm:$0xff] }
  0x2a   :  { %123 = vmatpush1.msra.mxu0 %v108_v2  ;;  %v104_v6 = vld [vmem:[#allocation5 + $0xd0] sm:$0xff]  ;;  %v103_v7 = vld [vmem:[#allocation5 + $0xc8] sm:$0xff]  ;;  %v102_v8 = vld [vmem:[#allocation5 + $0xc0] sm:$0xff] }
  0x2b   :  { %124 = vmatprep.subr.mxu0 %v107_v3  ;;  %v101_v9 = vld [vmem:[#allocation5 + $0xb8] sm:$0xff]  ;;  %v100_v10 = vld [vmem:[#allocation5 + $0xb0] sm:$0xff]  ;;  %v99_v11 = vld [vmem:[#allocation5 + $0xa8] sm:$0xff] }
  0x2c   :  { %125 = vmatpush1.msra.mxu0 %v106_v4  ;;  %v98_v12 = vld [vmem:[#allocation5 + $0xa0] sm:$0xff]  ;;  %v97_v13 = vld [vmem:[#allocation5 + $0x98] sm:$0xff]  ;;  %v96_v14 = vld [vmem:[#allocation5 + $0x90] sm:$0xff] }
  0x2d   :  { %126 = vmatprep.subr.mxu0 %v105_v5  ;;  %v95_v15 = vld [vmem:[#allocation5 + $0x88] sm:$0xff]  ;;  %v94_v16 = vld [vmem:[#allocation5 + $0x80] sm:$0xff]  ;;  %v93_v17 = vld [vmem:[#allocation5 + $0x78] sm:$0xff] }
  0x2e   :  { %127 = vmatpush1.msra.mxu0 %v104_v6  ;;  %v92_v18 = vld [vmem:[#allocation5 + $0x70] sm:$0xff]  ;;  %v91_v19 = vld [vmem:[#allocation5 + $0x68] sm:$0xff]  ;;  %v90_v20 = vld [vmem:[#allocation5 + $0x60] sm:$0xff] }
  0x2f   :  { %128 = vmatprep.subr.mxu0 %v103_v7  ;;  %v89_v21 = vld [vmem:[#allocation5 + $0x58] sm:$0xff]  ;;  %v88_v22 = vld [vmem:[#allocation5 + $0x50] sm:$0xff]  ;;  %v87_v23 = vld [vmem:[#allocation5 + $0x48] sm:$0xff] }
  0x30   :  { %129 = vmatpush1.msra.mxu0 %v102_v8  ;;  %v86_v24 = vld [vmem:[#allocation5 + $0x40] sm:$0xff]  ;;  %v85_v25 = vld [vmem:[#allocation5 + $0x38] sm:$0xff]  ;;  %v84_v26 = vld [vmem:[#allocation5 + $0x30] sm:$0xff] }
  0x31   :  { %130 = vmatprep.subr.mxu0 %v101_v9  ;;  %v83_v27 = vld [vmem:[#allocation5 + $0x28] sm:$0xff]  ;;  %v82_v28 = vld [vmem:[#allocation5 + $0x20] sm:$0xff]  ;;  %v81_v29 = vld [vmem:[#allocation5 + $0x18] sm:$0xff] }
  0x32   :  { %131 = vmatpush1.msra.mxu0 %v100_v10  ;;  %v80_v30 = vld [vmem:[#allocation5 + $0x10] sm:$0xff]  ;;  %v79_v31 = vld [vmem:[#allocation5 + $0x8] sm:$0xff]  ;;  %v78_v32 = vld [vmem:[#allocation5] sm:$0xff] }
  0x33   :  { %132 = vmatprep.subr.mxu0 %v99_v11  ;;  %v62_v33 = vld [vmem:[#allocation2] sm:$0xff]  ;;  %v63_v34 = vld [vmem:[#allocation2 + $0x8] sm:$0xff]  ;;  %v64_v35 = vld [vmem:[#allocation2 + $0x10] sm:$0xff] }
  0x34   :  { %133 = vmatpush1.msra.mxu0 %v98_v12  ;;  %v65_v36 = vld [vmem:[#allocation2 + $0x18] sm:$0xff]  ;;  %v66_v37 = vld [vmem:[#allocation2 + $0x20] sm:$0xff]  ;;  %v67_v38 = vld [vmem:[#allocation2 + $0x28] sm:$0xff] }
  0x35   :  { %134 = vmatprep.subr.mxu0 %v97_v13  ;;  %v68_v39 = vld [vmem:[#allocation2 + $0x30] sm:$0xff]  ;;  %v69_v40 = vld [vmem:[#allocation2 + $0x38] sm:$0xff]  ;;  %v70_v41 = vld [vmem:[#allocation2 + $0x40] sm:$0xff] }
  0x36   :  { %135 = vmatpush1.msra.mxu0 %v96_v14  ;;  %v71_v42 = vld [vmem:[#allocation2 + $0x48] sm:$0xff]  ;;  %v72_v43 = vld [vmem:[#allocation2 + $0x50] sm:$0xff]  ;;  %v73_v44 = vld [vmem:[#allocation2 + $0x58] sm:$0xff] }
  0x37   :  { %136 = vmatprep.subr.mxu0 %v95_v15  ;;  %v74_v45 = vld [vmem:[#allocation2 + $0x60] sm:$0xff]  ;;  %v75_v46 = vld [vmem:[#allocation2 + $0x68] sm:$0xff]  ;;  %v76_v47 = vld [vmem:[#allocation2 + $0x70] sm:$0xff] }
  0x38   :  { %137 = vmatpush1.msra.mxu0 %v94_v16  ;;  %v77_v48 = vld [vmem:[#allocation2 + $0x78] sm:$0xff]  ;;  %v1145_v51 = vld [vmem:[#allocation7 + $0xf0] sm:$0xff]  ;;  %v1144_v53 = vld [vmem:[#allocation7 + $0xe8] sm:$0xff] }
  0x39   :  { %138 = vmatprep.subr.mxu0 %v93_v17  ;;  %v1146_v49 = vld [vmem:[#allocation7 + $0xf8] sm:$0xff]  ;;  %v1129_v52 = vld [vmem:[#allocation7 + $0x70] sm:$0xff]  ;;  %v1128_v54 = vld [vmem:[#allocation7 + $0x68] sm:$0xff]  ;;  %v112_v17 = vlaneseq }
  0x3a   :  { %139 = vmatpush1.msra.mxu0 %v92_v18  ;;  %1334 = vmatprep.subr.mxu1 %v1146_v49  ;;  %v1130_v50 = vld [vmem:[#allocation7 + $0x78] sm:$0xff]  ;;  %v1143_v55 = vld [vmem:[#allocation7 + $0xe0] sm:$0xff]  ;;  %v1141_v59 = vld [vmem:[#allocation7 + $0xd0] sm:$0xff] }
  0x3b   :  { %140 = vmatprep.subr.mxu0 %v91_v19  ;;  %1335 = vmatpush3.msra.mxu1 %v1130_v50  ;;  %v1127_v56 = vld [vmem:[#allocation7 + $0x60] sm:$0xff]  ;;  %v1142_v57 = vld [vmem:[#allocation7 + $0xd8] sm:$0xff]  ;;  %v1125_v60 = vld [vmem:[#allocation7 + $0x50] sm:$0xff]  ;;  %v113_v18 = vshrl.u32 %v112_v17, 7 }
  0x3c   :  { %141 = vmatpush1.msra.mxu0 %v90_v20  ;;  %1336 = vmatprep.subr.mxu1 %v1145_v51  ;;  %v1126_v58 = vld [vmem:[#allocation7 + $0x58] sm:$0xff]  ;;  %v1140_v61 = vld [vmem:[#allocation7 + $0xc8] sm:$0xff]  ;;  %v1139_v63 = vld [vmem:[#allocation7 + $0xc0] sm:$0xff] }
  0x3d   :  { %142 = vmatprep.subr.mxu0 %v89_v21  ;;  %1337 = vmatpush3.msra.mxu1 %v1129_v52  ;;  %v1124_v62 = vld [vmem:[#allocation7 + $0x48] sm:$0xff]  ;;  %v1138_v1 = vld [vmem:[#allocation7 + $0xb8] sm:$0xff]  ;;  %v1137_v3 = vld [vmem:[#allocation7 + $0xb0] sm:$0xff]  ;;  %v114_v19 = vsub.s32 0, %v113_v18  ;;  %v118_v21 = vsub.s32 1, %v113_v18 }
  0x3e   :  { %143 = vmatpush1.msra.mxu0 %v88_v22  ;;  %1338 = vmatprep.subr.mxu1 %v1144_v53  ;;  %v1122_v2 = vld [vmem:[#allocation7 + $0x38] sm:$0xff]  ;;  %v1121_v4 = vld [vmem:[#allocation7 + $0x30] sm:$0xff]  ;;  %v1136_v5 = vld [vmem:[#allocation7 + $0xa8] sm:$0xff] }
  0x3f   :  { %144 = vmatprep.subr.mxu0 %v87_v23  ;;  %1339 = vmatpush3.msra.mxu1 %v1128_v54  ;;  %v1120_v6 = vld [vmem:[#allocation7 + $0x28] sm:$0xff]  ;;  %v1135_v7 = vld [vmem:[#allocation7 + $0xa0] sm:$0xff]  ;;  %v1134_v9 = vld [vmem:[#allocation7 + $0x98] sm:$0xff] }
  0x40   :  { %145 = vmatpush1.msra.mxu0 %v86_v24  ;;  %1340 = vmatprep.subr.mxu1 %v1143_v55  ;;  %v1119_v8 = vld [vmem:[#allocation7 + $0x20] sm:$0xff]  ;;  %v1118_v10 = vld [vmem:[#allocation7 + $0x18] sm:$0xff]  ;;  %v1133_v11 = vld [vmem:[#allocation7 + $0x90] sm:$0xff] }
  0x41   :  { %146 = vmatprep.subr.mxu0 %v85_v25  ;;  %1341 = vmatpush3.msra.mxu1 %v1127_v56  ;;  %v1117_v12 = vld [vmem:[#allocation7 + $0x10] sm:$0xff]  ;;  %v1132_v13 = vld [vmem:[#allocation7 + $0x88] sm:$0xff]  ;;  %v1131_v15 = vld [vmem:[#allocation7 + $0x80] sm:$0xff] }
  0x42   :  { %147 = vmatpush1.msra.mxu0 %v84_v26  ;;  %1342 = vmatprep.subr.mxu1 %v1142_v57  ;;  %v1116_v14 = vld [vmem:[#allocation7 + $0x8] sm:$0xff]  ;;  %v1115_v16 = vld [vmem:[#allocation7] sm:$0xff] }
  0x43   :  { %148 = vmatprep.subr.mxu0 %v83_v27  ;;  %1343 = vmatpush3.msra.mxu1 %v1126_v58  ;;  %v110_v20 = vld [vmem:[%s2507_s2] sm:$0x3] }
  0x44   :  { %149 = vmatpush1.msra.mxu0 %v82_v28  ;;  %1344 = vmatprep.subr.mxu1 %v1141_v59  ;;  %v1710_v22 = vrot.slane %v110_v20, %v114_v19  ;;  %v1712_v23 = vrot.slane %v110_v20, %v118_v21 }
  0x45   :  { %150 = vmatprep.subr.mxu0 %v81_v29  ;;  %1345 = vmatpush3.msra.mxu1 %v1125_v60 }
  0x46   :  { %151 = vmatpush1.msra.mxu0 %v80_v30  ;;  %1346 = vmatprep.subr.mxu1 %v1140_v61 }
  0x47   :  { %152 = vmatprep.subr.mxu0 %v79_v31  ;;  %1347 = vmatpush3.msra.mxu1 %v1124_v62 }
  0x48   :  { %153 = vmatpush1.msra.mxu0 %v78_v32  ;;  %1348 = vmatprep.subr.mxu1 %v1139_v63 }
  0x49   :  { %187 = vmatmul.mubr.f32.vlgmr.msra.gmra.mxu0 %v62_v33 }
  0x4a   :  { %192 = vmatprep.mubr.f32.mxu0 %v1644_v0 }
  0x4d   :  { %193 = vmatmul.mubr.f32.gmra.mxu0 %v63_v34 }
  0x4e   :  { %198 = vmatprep.mubr.f32.mxu0 %v1644_v0 }
  0x51   :  { %199 = vmatmul.mubr.f32.gmra.mxu0 %v64_v35 }
  0x52   :  { %204 = vmatprep.mubr.f32.mxu0 %v1644_v0 }
  0x55   :  { %205 = vmatmul.mubr.f32.gmra.mxu0 %v65_v36 }
  0x56   :  { %210 = vmatprep.mubr.f32.mxu0 %v1644_v0 }
  0x59   :  { %211 = vmatmul.mubr.f32.gmra.mxu0 %v66_v37 }
  0x5a   :  { %216 = vmatprep.mubr.f32.mxu0 %v1644_v0 }
  0x5d   :  { %217 = vmatmul.mubr.f32.gmra.mxu0 %v67_v38 }
  0x5e   :  { %222 = vmatprep.mubr.f32.mxu0 %v1644_v0 }
  0x61   :  { %223 = vmatmul.mubr.f32.gmra.mxu0 %v68_v39 }
  0x62   :  { %228 = vmatprep.mubr.f32.mxu0 %v1644_v0 }
  0x65   :  { %229 = vmatmul.mubr.f32.gmra.mxu0 %v69_v40 }
  0x66   :  { %234 = vmatprep.mubr.f32.mxu0 %v1644_v0 }
  0x69   :  { %235 = vmatmul.mubr.f32.gmra.mxu0 %v70_v41 }
  0x6a   :  { %240 = vmatprep.mubr.f32.mxu0 %v1644_v0 }
  0x6d   :  { %241 = vmatmul.mubr.f32.gmra.mxu0 %v71_v42 }
  0x6e   :  { %246 = vmatprep.mubr.f32.mxu0 %v1644_v0 }
  0x71   :  { %247 = vmatmul.mubr.f32.gmra.mxu0 %v72_v43 }
  0x72   :  { %252 = vmatprep.mubr.f32.mxu0 %v1644_v0 }
  0x75   :  { %253 = vmatmul.mubr.f32.gmra.mxu0 %v73_v44 }
  0x76   :  { %258 = vmatprep.mubr.f32.mxu0 %v1644_v0 }
  0x79   :  { %259 = vmatmul.mubr.f32.gmra.mxu0 %v74_v45 }
  0x7a   :  { %264 = vmatprep.mubr.f32.mxu0 %v1644_v0 }
  0x7d   :  { %265 = vmatmul.mubr.f32.gmra.mxu0 %v75_v46 }
  0x7e   :  { %270 = vmatprep.mubr.f32.mxu0 %v1644_v0 }
  0x81   :  { %271 = vmatmul.mubr.f32.gmra.mxu0 %v76_v47 }
  0x82   :  { %276 = vmatprep.mubr.f32.mxu0 %v1644_v0  ;;  %v1123_v0 = vld [vmem:[#allocation7 + $0x40] sm:$0xff] }
  0x83   :  { %1349 = vmatpush3.msra.mxu1 %v1123_v0 }
  0x84   :  { %1350 = vmatprep.subr.mxu1 %v1138_v1 }
  0x85   :  { %277 = vmatmul.mubr.f32.gmra.mxu0 %v77_v48  ;;  %1351 = vmatpush3.msra.mxu1 %v1122_v2 }
  0x86   :  { %1352 = vmatprep.subr.mxu1 %v1137_v3 }
  0x87   :  { %1353 = vmatpush3.msra.mxu1 %v1121_v4 }
  0x88   :  { %1354 = vmatprep.subr.mxu1 %v1136_v5 }
  0x89   :  { %1355 = vmatpush3.msra.mxu1 %v1120_v6 }
  0x8a   :  { %1356 = vmatprep.subr.mxu1 %v1135_v7 }
  0x8b   :  { %1357 = vmatpush3.msra.mxu1 %v1119_v8 }
  0x8c   :  { %1358 = vmatprep.subr.mxu1 %v1134_v9 }
  0x8d   :  { %1359 = vmatpush3.msra.mxu1 %v1118_v10 }
  0x8e   :  { %1360 = vmatprep.subr.mxu1 %v1133_v11 }
  0x8f   :  { %1361 = vmatpush3.msra.mxu1 %v1117_v12 }
  0x90   :  { %1362 = vmatprep.subr.mxu1 %v1132_v13 }
  0x91   :  { %1363 = vmatpush3.msra.mxu1 %v1116_v14 }
  0x92   :  { %1364 = vmatprep.subr.mxu1 %v1131_v15 }
  0x93   :  { %1365 = vmatpush3.msra.mxu1 %v1115_v16 }
 0x109   :  { %v188_v24 = vpop.f32.mrf.mxu0 }
 0x10a   :  { %v1715_v25 = vadd.f32 %v188_v24, %v1710_v22 }
 0x10b   :  { %v190_v26 = vpop.f32.mrf.mxu0 }
 0x10c   :  { %v1718_v27 = vmul.f32 0.70710677, %v1715_v25  ;;  %v1721_v28 = vadd.f32 %v190_v26, %v1712_v23 }
 0x10d   :  { %v194_v29 = vpop.f32.mrf.mxu0 }
 0x10e   :  { %v1724_v30 = vadd.f32 %v194_v29, %v1710_v22  ;;  %v347_v31 = vand.u32 2147483647, %v1718_v27  ;;  %v1728_v32 = vmul.f32 0.70710677, %v1721_v28  ;;  %vm955_vm0 = vcmp.ge.f32.partialorder %v1718_v27, 0.0 }
 0x10f   :  { %v196_v33 = vpop.f32.mrf.mxu0 }
 0x110   :  { %v1731_v34 = vadd.f32 %v196_v33, %v1712_v23  ;;  %v1734_v36 = vmul.f32 0.70710677, %v1724_v30  ;;  %v763_v37 = vsub.f32 0.0, %v347_v31  ;;  %v348_v38 = vand.u32 2147483647, %v1728_v32 }
 0x111   :  { %v200_v35 = vpop.f32.mrf.mxu0  ;;  %v379_v42 = vmul.f32 0.3275911, %v347_v31  ;;  %vm956_vm1 = vcmp.ge.f32.partialorder %v1728_v32, 0.0 }
 0x112   :  { %v1738_v40 = vmul.f32 0.70710677, %v1731_v34  ;;  %v349_v43 = vand.u32 2147483647, %v1734_v36  ;;  %v1742_v44 = vadd.f32 %v200_v35, %v1710_v22  ;;  %v795_v46 = vmul.f32 %v763_v37, %v347_v31 }
 0x113   :  { %v202_v39 = vpop.f32.mrf.mxu0  ;;  %v764_v47 = vsub.f32 0.0, %v348_v38  ;;  %v380_v49 = vmul.f32 0.3275911, %v348_v38  ;;  %v411_v53 = vadd.f32 1.0, %v379_v42  ;;  %vm957_vm3 = vcmp.ge.f32.partialorder %v1734_v36, 0.0 }
 0x114   :  { %v1745_v45 = vadd.f32 %v202_v39, %v1712_v23  ;;  %v350_v50 = vand.u32 2147483647, %v1738_v40  ;;  %v1749_v51 = vmul.f32 0.70710677, %v1742_v44  ;;  %v765_v54 = vsub.f32 0.0, %v349_v43 }
 0x115   :  { %v206_v41 = vpop.f32.mrf.mxu0  ;;  %v827_v57 = vmul.f32 1.442695, %v795_v46  ;;  %v796_v58 = vmul.f32 %v764_v47, %v348_v38  ;;  %v412_v61 = vadd.f32 1.0, %v380_v49  ;;  %v381_v0 = vmul.f32 0.3275911, %v349_v43 }
 0x116   :  { %2566 = vst [vmem:[#allocation12_spill] sm:$0xff] %v1749_v51  ;;  %v351_v55 = vand.u32 2147483647, %v1749_v51  ;;  %v1753_v56 = vmul.f32 0.70710677, %v1745_v45  ;;  %v1756_v59 = vadd.f32 %v206_v41, %v1710_v22  ;;  %v766_v62 = vsub.f32 0.0, %v350_v50 }
 0x117   :  { %v208_v48 = vpop.f32.mrf.mxu0  ;;  %1423 = vrcp.f32 %v411_v53  ;;  %v797_v4 = vmul.f32 %v765_v54, %v349_v43  ;;  %v829_v7 = vmul.f32 1.442695, %v796_v58  ;;  %v382_v8 = vmul.f32 0.3275911, %v350_v50 }
 0x118   :  { %v1759_v63 = vadd.f32 %v208_v48, %v1712_v23  ;;  %v352_v1 = vand.u32 2147483647, %v1753_v56  ;;  %v1763_v2 = vmul.f32 0.70710677, %v1756_v59  ;;  %v767_v5 = vsub.f32 0.0, %v351_v55 }
 0x119   :  { %v212_v52 = vpop.f32.mrf.mxu0  ;;  %1425 = vpow2.f32 %v827_v57  ;;  %v798_v10 = vmul.f32 %v766_v62, %v350_v50  ;;  %v413_v14 = vadd.f32 1.0, %v381_v0  ;;  %v383_v15 = vmul.f32 0.3275911, %v351_v55 }
 0x11a   :  { %2567 = vst [vmem:[#allocation13_spill] sm:$0xff] %v1763_v2  ;;  %v1766_v6 = vadd.f32 %v212_v52, %v1710_v22  ;;  %v768_v11 = vsub.f32 0.0, %v352_v1  ;;  %v353_v12 = vand.u32 2147483647, %v1763_v2  ;;  %v1770_v13 = vmul.f32 0.70710677, %v1759_v63 }
 0x11b   :  { %v214_v60 = vpop.f32.mrf.mxu0  ;;  %1427 = vrcp.f32 %v412_v61  ;;  %v831_v17 = vmul.f32 1.442695, %v797_v4  ;;  %v799_v18 = vmul.f32 %v767_v5, %v351_v55  ;;  %v414_v21 = vadd.f32 1.0, %v382_v8 }
 0x11c   :  { %2568 = vst [vmem:[#allocation14_spill] sm:$0xff] %v1770_v13  ;;  %v354_v19 = vand.u32 2147483647, %v1770_v13  ;;  %v1774_v20 = vmul.f32 0.70710677, %v1766_v6  ;;  %1429 = vpow2.f32 %v829_v7  ;;  %v800_v31 = vmul.f32 %v768_v11, %v352_v1 }
 0x11d   :  { %v218_v3 = vpop.f32.mrf.mxu0  ;;  %v384_v24 = vmul.f32 0.3275911, %v352_v1  ;;  %v833_v29 = vmul.f32 1.442695, %v798_v10  ;;  %v769_v33 = vsub.f32 0.0, %v353_v12  ;;  %1431 = vrcp.f32 %v413_v14 }
 0x11e   :  { %2569 = vst [vmem:[#allocation15_spill] sm:$0xff] %v1774_v20  ;;  %v355_v35 = vand.u32 2147483647, %v1774_v20  ;;  %v415_v37 = vadd.f32 1.0, %v383_v15  ;;  %v1778_v38 = vadd.f32 %v214_v60, %v1712_v23  ;;  %v1781_v39 = vadd.f32 %v218_v3, %v1710_v22 }
 0x11f   :  { %v220_v9 = vpop.f32.mrf.mxu0  ;;  %1433 = vpow2.f32 %v831_v17  ;;  %v835_v42 = vmul.f32 1.442695, %v799_v18  ;;  %v385_v43 = vmul.f32 0.3275911, %v353_v12  ;;  %v770_v46 = vsub.f32 0.0, %v354_v19 }
 0x120   :  { %1435 = vrcp.f32 %v414_v21  ;;  %v416_v47 = vadd.f32 1.0, %v384_v24  ;;  %v1786_v48 = vmul.f32 0.70710677, %v1778_v38  ;;  %v837_v50 = vmul.f32 1.442695, %v800_v31 }
 0x121   :  { %v224_v16 = vpop.f32.mrf.mxu0  ;;  %1437 = vpow2.f32 %v833_v29  ;;  %v801_v52 = vmul.f32 %v769_v33, %v353_v12  ;;  %v771_v53 = vsub.f32 0.0, %v355_v35  ;;  %v386_v54 = vmul.f32 0.3275911, %v354_v19 }
 0x122   :  { %2570 = vst [vmem:[#allocation16_spill] sm:$0xff] %v1786_v48  ;;  %1439 = vrcp.f32 %v415_v37  ;;  %v356_v55 = vand.u32 2147483647, %v1786_v48  ;;  %v1790_v57 = vmul.f32 0.70710677, %v1781_v39  ;;  %v417_v60 = vadd.f32 1.0, %v385_v43 }
 0x123   :  { %v226_v26 = vpop.f32.mrf.mxu0  ;;  %1441 = vpow2.f32 %v835_v42  ;;  %v802_v61 = vmul.f32 %v770_v46, %v354_v19  ;;  %v1795_v62 = vadd.f32 %v220_v9, %v1712_v23  ;;  %v387_v1 = vmul.f32 0.3275911, %v355_v35 }
 0x124   :  { %2571 = vst [vmem:[#allocation17_spill] sm:$0xff] %v1790_v57  ;;  %v1797_v0 = vpop.eup %1423  ;;  %1443 = vrcp.f32 %v416_v47  ;;  %v772_v3 = vsub.f32 0.0, %v356_v55  ;;  %v1800_v4 = vadd.f32 %v224_v16, %v1710_v22  ;;  %v839_v8 = vmul.f32 1.442695, %v801_v52 }
 0x125   :  { %v1783_v41 = vpop.f32.mrf.mxu0  ;;  %v803_v10 = vmul.f32 %v771_v53, %v355_v35  ;;  %v357_v11 = vand.u32 2147483647, %v1790_v57  ;;  %v1808_v12 = vmul.f32 0.70710677, %v1795_v62  ;;  %1445 = vpow2.f32 %v837_v50 }
 0x126   :  { %v1804_v7 = vpop.eup %1425  ;;  %v418_v9 = vadd.f32 1.0, %v386_v54  ;;  %v1811_v14 = vadd.f32 %v226_v26, %v1712_v23  ;;  %1447 = vrcp.f32 %v417_v60  ;;  %v841_v16 = vmul.f32 1.442695, %v802_v61 }
 0x127   :  { %v232_v49 = vpop.f32.mrf.mxu0  ;;  %2572 = vst [vmem:[#allocation18_spill] sm:$0xff] %v1808_v12  ;;  %v388_v17 = vmul.f32 0.3275911, %v356_v55  ;;  %v358_v18 = vand.u32 2147483647, %v1808_v12  ;;  %v419_v19 = vadd.f32 1.0, %v387_v1  ;;  %v804_v21 = vmul.f32 %v772_v3, %v356_v55 }
 0x128   :  { %v1813_v15 = vpop.eup %1427  ;;  %v773_v24 = vsub.f32 0.0, %v357_v11  ;;  %v1817_v29 = vmul.f32 0.70710677, %v1800_v4  ;;  %1449 = vpow2.f32 %v839_v8  ;;  %v843_v35 = vmul.f32 1.442695, %v803_v10 }
 0x129   :  { %v1792_v58 = vpop.f32.mrf.mxu0  ;;  %v1819_v33 = vpop.eup %1429  ;;  %1451 = vrcp.f32 %v418_v9  ;;  %v389_v26 = vmul.f32 0.3275911, %v357_v11  ;;  %v1823_v42 = vmul.f32 0.70710677, %v1811_v14  ;;  %v420_v46 = vadd.f32 1.0, %v388_v17 }
 0x12a   :  { %2573 = vst [vmem:[#allocation19_spill] sm:$0xff] %v1817_v29  ;;  %v359_v37 = vand.u32 2147483647, %v1817_v29  ;;  %v1825_v43 = vpop.eup %1431  ;;  %1453 = vpow2.f32 %v841_v16  ;;  %v774_v47 = vsub.f32 0.0, %v358_v18  ;;  %v845_v52 = vmul.f32 1.442695, %v804_v21 }
 0x12b   :  { %v1802_v5 = vpop.f32.mrf.mxu0  ;;  %2574 = vst [vmem:[#allocation20_spill] sm:$0xff] %v1823_v42  ;;  %1455 = vrcp.f32 %v419_v19  ;;  %v805_v53 = vmul.f32 %v773_v24, %v357_v11  ;;  %v390_v54 = vmul.f32 0.3275911, %v358_v18  ;;  %v360_v1 = vand.u32 2147483647, %v1823_v42 }
 0x12c   :  { %v1827_v50 = vpop.eup %1433  ;;  %v775_v61 = vsub.f32 0.0, %v359_v37  ;;  %v1836_v3 = vadd.f32 %v1783_v41, %v1710_v22  ;;  %v1839_v8 = vadd.f32 %v232_v49, %v1712_v23  ;;  %1457 = vpow2.f32 %v843_v35 }
 0x12d   :  { %v242_v31 = vpop.f32.mrf.mxu0  ;;  %v1831_v60 = vpop.eup %1435  ;;  %v421_v9 = vadd.f32 1.0, %v389_v26  ;;  %v1846_v16 = vmul.f32 0.5, %v1715_v25  ;;  %1459 = vrcp.f32 %v420_v46  ;;  %v806_v17 = vmul.f32 %v774_v47, %v358_v18 }
 0x12e   :  { %v1841_v10 = vpop.eup %1437  ;;  %v1849_v19 = vmul.f32 0.70710677, %v1836_v3  ;;  %1461 = vpow2.f32 %v845_v52  ;;  %v847_v41 = vmul.f32 1.442695, %v805_v53  ;;  %v422_v49 = vadd.f32 1.0, %v390_v54 }
 0x12f   :  { %v1829_v55 = vpop.f32.mrf.mxu0  ;;  %v1843_v11 = vpop.eup %1439  ;;  %v391_v24 = vmul.f32 0.3275911, %v359_v37  ;;  %v807_v35 = vmul.f32 %v775_v61, %v359_v37  ;;  %v776_v26 = vsub.f32 0.0, %v360_v1  ;;  %v1857_v25 = vmul.f32 0.70710677, %v1839_v8 }
 0x130   :  { %2575 = vst [vmem:[#allocation21_spill] sm:$0xff] %v1849_v19  ;;  %v1851_v21 = vpop.eup %1441  ;;  %v361_v57 = vand.u32 2147483647, %v1849_v19  ;;  %v1860_v18 = vmul.f32 0.5, %v1724_v30  ;;  %1463 = vrcp.f32 %v421_v9  ;;  %v1864_v46 = vadd.f32 %v1792_v58, %v1710_v22 }
 0x131   :  { %2576 = vst [vmem:[#allocation22_spill] sm:$0xff] %v1851_v21  ;;  %v248_v29 = vpop.f32.mrf.mxu0  ;;  %v1853_v42 = vpop.eup %1443  ;;  %2577 = vst [vmem:[#allocation23_spill] sm:$0xff] %v1857_v25  ;;  %v1867_v47 = vmul.f32 0.5, %v1721_v28  ;;  %v849_v37 = vmul.f32 1.442695, %v806_v17  ;;  %v1873_v61 = vadd.f32 %v1802_v5, %v1712_v23  ;;  %1465 = vpow2.f32 %v847_v41 }
 0x132   :  { %2578 = vst [vmem:[#allocation24_spill] sm:$0xff] %v1860_v18  ;;  %v1869_v52 = vpop.eup %1445  ;;  %v392_v53 = vmul.f32 0.3275911, %v360_v1  ;;  %v777_v54 = vsub.f32 0.0, %v361_v57  ;;  %v423_v30 = vadd.f32 1.0, %v391_v24  ;;  %1467 = vrcp.f32 %v422_v49 }
 0x133   :  { %v1875_v19 = vpop.eup %1447  ;;  %v362_v9 = vand.u32 2147483647, %v1857_v25  ;;  %v1879_v58 = vmul.f32 0.70710677, %v1864_v46  ;;  %v1881_v28 = vpop.f32.mrf.mxu0  ;;  %v851_v12 = vmul.f32 1.442695, %v807_v35  ;;  %v808_v17 = vmul.f32 %v776_v26, %v360_v1 }
 0x134   :  { %v1884_v20 = vadd.f32 %v242_v31, %v1710_v22  ;;  %v393_v5 = vmul.f32 0.3275911, %v361_v57  ;;  %v809_v2 = vmul.f32 %v777_v54, %v361_v57  ;;  %v1892_v25 = vmul.f32 0.5, %v1731_v34 }
 0x135   :  { %2579 = vst [vmem:[#allocation25_spill] sm:$0xff] %v1879_v58  ;;  %v1886_v48 = vpop.eup %1449  ;;  %v778_v13 = vsub.f32 0.0, %v362_v9  ;;  %v363_v41 = vand.u32 2147483647, %v1879_v58  ;;  %1469 = vpow2.f32 %v849_v37  ;;  %v424_v21 = vadd.f32 1.0, %v392_v53  ;;  %v254_v26 = vpop.f32.mrf.mxu0 }
 0x136   :  { %2580 = vst [vmem:[#allocation26_spill] sm:$0xff] %v1886_v48  ;;  %v1889_v24 = vpop.eup %1451  ;;  %v1895_v49 = vmul.f32 0.70710677, %v1873_v61  ;;  %v1900_v31 = vmul.f32 0.5, %v1742_v44  ;;  %1471 = vrcp.f32 %v423_v30  ;;  %v394_v57 = vmul.f32 0.3275911, %v362_v9 }
 0x137   :  { %v1897_v1 = vpop.eup %1453  ;;  %v779_v35 = vsub.f32 0.0, %v363_v41  ;;  %v853_v58 = vmul.f32 1.442695, %v808_v17  ;;  %v810_v48 = vmul.f32 %v778_v13, %v362_v9  ;;  %v1906_v37 = vmul.f32 0.70710677, %v1884_v20 }
 0x138   :  { %2581 = vst [vmem:[#allocation27_spill] sm:$0xff] %v1895_v49  ;;  %2582 = vst [vmem:[#allocation28_spill] sm:$0xff] %v1897_v1  ;;  %v1902_v54 = vpop.eup %1455  ;;  %v364_v34 = vand.u32 2147483647, %v1895_v49  ;;  %v1909_v53 = vmul.f32 0.5, %v1745_v45  ;;  %1473 = vpow2.f32 %v851_v12  ;;  %v425_v1 = vadd.f32 1.0, %v393_v5  ;;  %v256_v12 = vpop.f32.mrf.mxu0 }
 0x139   :  { %2583 = vst [vmem:[#allocation29_spill] sm:$0xff] %v1900_v31  ;;  %2584 = vst [vmem:[#allocation30_spill] sm:$0xff] %v1906_v37  ;;  %v855_v44 = vmul.f32 1.442695, %v809_v2  ;;  %v1911_v31 = vpop.eup %1457  ;;  %1475 = vrcp.f32 %v424_v21  ;;  %v395_v30 = vmul.f32 0.3275911, %v363_v41  ;;  %v811_v9 = vmul.f32 %v779_v35, %v363_v41 }
 0x13a   :  { %2585 = vst [vmem:[#allocation31_spill] sm:$0xff] %v1911_v31  ;;  %v780_v18 = vsub.f32 0.0, %v364_v34  ;;  %v365_v51 = vand.u32 2147483647, %v1906_v37  ;;  %v1914_v17 = vpop.eup %1459  ;;  %v426_v13 = vadd.f32 1.0, %v394_v57  ;;  %v1918_v49 = vadd.f32 %v1829_v55, %v1712_v23 }
 0x13b   :  { %v1921_v45 = vadd.f32 %v248_v29, %v1710_v22  ;;  %v1923_v2 = vpop.eup %1461  ;;  %v1926_v21 = vmul.f32 0.5, %v1756_v59  ;;  %v1929_v5 = vmul.f32 0.5, %v1759_v63  ;;  %1477 = vpow2.f32 %v853_v58  ;;  %v260_v58 = vpop.f32.mrf.mxu0 }
 0x13c   :  { %2586 = vst [vmem:[#allocation32_spill] sm:$0xff] %v1923_v2  ;;  %v857_v37 = vmul.f32 1.442695, %v810_v48  ;;  %1479 = vrcp.f32 %v425_v1  ;;  %v396_v41 = vmul.f32 0.3275911, %v364_v34  ;;  %v781_v57 = vsub.f32 0.0, %v365_v51 }
 0x13d   :  { %2587 = vst [vmem:[#allocation33_spill] sm:$0xff] %v1926_v21  ;;  %2588 = vst [vmem:[#allocation34_spill] sm:$0xff] %v1929_v5  ;;  %v1932_v55 = vmul.f32 0.70710677, %v1918_v49  ;;  %v1934_v35 = vpop.eup %1463  ;;  %v1937_v29 = vmul.f32 0.5, %v1766_v6  ;;  %1481 = vpow2.f32 %v855_v44  ;;  %v427_v31 = vadd.f32 1.0, %v395_v30 }
 0x13e   :  { %v812_v59 = vmul.f32 %v780_v18, %v364_v34  ;;  %1483 = vrcp.f32 %v426_v13  ;;  %v859_v21 = vmul.f32 1.442695, %v811_v9  ;;  %v1941_v48 = vmul.f32 0.70710677, %v1921_v45  ;;  %v1943_v1 = vpop.eup %1465 }
 0x13f   :  { %2589 = vst [vmem:[#allocation35_spill] sm:$0xff] %v1932_v55  ;;  %2590 = vst [vmem:[#allocation36_spill] sm:$0xff] %v1937_v29  ;;  %v366_v63 = vand.u32 2147483647, %v1932_v55  ;;  %v1946_v5 = vmul.f32 0.5, %v1778_v38  ;;  %1485 = vpow2.f32 %v857_v37  ;;  %v1950_v6 = vadd.f32 %v1881_v28, %v1712_v23  ;;  %v1952_v18 = vpop.eup %1467 }
 0x140   :  { %2591 = vst [vmem:[#allocation37_spill] sm:$0xff] %v1941_v48  ;;  %2592 = vst [vmem:[#allocation38_spill] sm:$0xff] %v1943_v1  ;;  %v397_v2 = vmul.f32 0.3275911, %v365_v51  ;;  %v428_v34 = vadd.f32 1.0, %v396_v41  ;;  %v813_v44 = vmul.f32 %v781_v57, %v365_v51  ;;  %v1955_v13 = vadd.f32 %v254_v26, %v1710_v22  ;;  %v262_v41 = vpop.f32.mrf.mxu0 }
 0x141   :  { %2593 = vst [vmem:[#allocation39_spill] sm:$0xff] %v1946_v5  ;;  %v782_v30 = vsub.f32 0.0, %v366_v63  ;;  %1487 = vrcp.f32 %v427_v31  ;;  %v861_v9 = vmul.f32 1.442695, %v812_v59  ;;  %v367_v55 = vand.u32 2147483647, %v1941_v48 }
 0x142   :  { %v1959_v38 = vmul.f32 0.70710677, %v1950_v6  ;;  %v1961_v37 = vpop.eup %1469  ;;  %v1964_v28 = vmul.f32 0.5, %v1781_v39  ;;  %1489 = vpow2.f32 %v859_v21  ;;  %v398_v1 = vmul.f32 0.3275911, %v366_v63 }
 0x143   :  { %2595 = vst [vmem:[#allocation41_spill] sm:$0xff] %v1961_v37  ;;  %v1967_v51 = vadd.f32 %v256_v12, %v1712_v23  ;;  %v1969_v26 = vpop.eup %1471  ;;  %v429_v31 = vadd.f32 1.0, %v397_v2  ;;  %v814_v57 = vmul.f32 %v782_v30, %v366_v63  ;;  %v783_v59 = vsub.f32 0.0, %v367_v55 }
 0x144   :  { %2594 = vst [vmem:[#allocation40_spill] sm:$0xff] %v1959_v38  ;;  %2596 = vst [vmem:[#allocation42_spill] sm:$0xff] %v1964_v28  ;;  %v368_v48 = vand.u32 2147483647, %v1959_v38  ;;  %1491 = vrcp.f32 %v428_v34  ;;  %v863_v29 = vmul.f32 1.442695, %v813_v44  ;;  %v266_v28 = vpop.f32.mrf.mxu0 }
 0x145   :  { %2597 = vst [vmem:[#allocation43_spill] sm:$0xff] %v1969_v26  ;;  %v399_v5 = vmul.f32 0.3275911, %v367_v55  ;;  %v1973_v37 = vmul.f32 0.70710677, %v1955_v13  ;;  %v1975_v39 = vpop.eup %1473  ;;  %v1978_v21 = vmul.f32 0.5, %v1795_v62  ;;  %1493 = vpow2.f32 %v861_v9 }
 0x146   :  { %2599 = vst [vmem:[#allocation45_spill] sm:$0xff] %v1975_v39  ;;  %v1981_v12 = vmul.f32 0.5, %v1800_v4  ;;  %v784_v2 = vsub.f32 0.0, %v368_v48  ;;  %v1983_v63 = vpop.eup %1475  ;;  %v430_v30 = vadd.f32 1.0, %v398_v1  ;;  %v815_v38 = vmul.f32 %v783_v59, %v367_v55 }
 0x147   :  { %2598 = vst [vmem:[#allocation44_spill] sm:$0xff] %v1973_v37  ;;  %2600 = vst [vmem:[#allocation46_spill] sm:$0xff] %v1978_v21  ;;  %v369_v34 = vand.u32 2147483647, %v1973_v37  ;;  %v1987_v44 = vmul.f32 0.70710677, %v1967_v51  ;;  %1495 = vrcp.f32 %v429_v31  ;;  %v2001_v26 = vadd.f32 %v260_v58, %v1710_v22 }
 0x148   :  { %2601 = vst [vmem:[#allocation47_spill] sm:$0xff] %v1981_v12  ;;  %v1990_v39 = vmul.f32 0.5, %v1811_v14  ;;  %v1993_v62 = vmul.f32 0.5, %v1836_v3  ;;  %v865_v4 = vmul.f32 1.442695, %v814_v57  ;;  %v1995_v9 = vpop.eup %1477  ;;  %1497 = vpow2.f32 %v863_v29  ;;  %v268_v57 = vpop.f32.mrf.mxu0 }
 0x149   :  { %2602 = vst [vmem:[#allocation48_spill] sm:$0xff] %v1987_v44  ;;  %v431_v12 = vadd.f32 1.0, %v399_v5  ;;  %v400_v1 = vmul.f32 0.3275911, %v368_v48  ;;  %v370_v55 = vand.u32 2147483647, %v1987_v44  ;;  %v1998_v59 = vpop.eup %1479  ;;  %v816_v37 = vmul.f32 %v784_v2, %v368_v48 }
 0x14a   :  { %2603 = vst [vmem:[#allocation49_spill] sm:$0xff] %v1990_v39  ;;  %2604 = vst [vmem:[#allocation50_spill] sm:$0xff] %v1993_v62  ;;  %v785_v21 = vsub.f32 0.0, %v369_v34  ;;  %v2004_v14 = vadd.f32 %v262_v41, %v1712_v23  ;;  %v2006_v3 = vpop.eup %1481  ;;  %v2009_v31 = vmul.f32 0.5, %v1839_v8  ;;  %v2012_v5 = vmul.f32 0.5, %v1864_v46 }
 0x14b   :  { %2605 = vst [vmem:[#allocation51_spill] sm:$0xff] %v2006_v3  ;;  %1499 = vrcp.f32 %v430_v30  ;;  %v867_v29 = vmul.f32 1.442695, %v815_v38  ;;  %v2014_v44 = vpop.eup %1483  ;;  %v401_v48 = vmul.f32 0.3275911, %v369_v34  ;;  %v786_v58 = vsub.f32 0.0, %v370_v55 }
 0x14c   :  { %2606 = vst [vmem:[#allocation52_spill] sm:$0xff] %v2009_v31  ;;  %2607 = vst [vmem:[#allocation53_spill] sm:$0xff] %v2012_v5  ;;  %1501 = vpow2.f32 %v865_v4  ;;  %v2017_v2 = vmul.f32 0.70710677, %v2001_v26  ;;  %v2019_v41 = vpop.eup %1485  ;;  %v2022_v62 = vmul.f32 0.5, %v1873_v61  ;;  %v2025_v8 = vmul.f32 0.5, %v1884_v20  ;;  %v272_v20 = vpop.f32.mrf.mxu0 }
 0x14d   :  { %2609 = vst [vmem:[#allocation55_spill] sm:$0xff] %v2019_v41  ;;  %1503 = vrcp.f32 %v431_v12  ;;  %v432_v46 = vadd.f32 1.0, %v400_v1  ;;  %v869_v38 = vmul.f32 1.442695, %v816_v37  ;;  %v817_v30 = vmul.f32 %v785_v21, %v369_v34 }
 0x14e   :  { %2608 = vst [vmem:[#allocation54_spill] sm:$0xff] %v2017_v2  ;;  %2610 = vst [vmem:[#allocation56_spill] sm:$0xff] %v2022_v62  ;;  %v371_v5 = vand.u32 2147483647, %v2017_v2  ;;  %v2029_v4 = vmul.f32 0.70710677, %v2004_v14  ;;  %v2031_v31 = vpop.eup %1487  ;;  %1505 = vpow2.f32 %v867_v29  ;;  %v2037_v62 = vadd.f32 %v266_v28, %v1710_v22 }
 0x14f   :  { %2611 = vst [vmem:[#allocation57_spill] sm:$0xff] %v2025_v8  ;;  %v2034_v3 = vmul.f32 0.5, %v1918_v49  ;;  %v402_v61 = vmul.f32 0.3275911, %v370_v55  ;;  %v2039_v12 = vpop.eup %1489  ;;  %v433_v37 = vadd.f32 1.0, %v401_v48  ;;  %v818_v21 = vmul.f32 %v786_v58, %v370_v55 }
 0x150   :  { %2612 = vst [vmem:[#allocation58_spill] sm:$0xff] %v2029_v4  ;;  %2614 = vst [vmem:[#allocation60_spill] sm:$0xff] %v2037_v62  ;;  %v787_v34 = vsub.f32 0.0, %v371_v5  ;;  %v2042_v1 = vadd.f32 %v268_v57, %v1712_v23  ;;  %1507 = vrcp.f32 %v432_v46  ;;  %v403_v2 = vmul.f32 0.3275911, %v371_v5 }
 0x151   :  { %2613 = vst [vmem:[#allocation59_spill] sm:$0xff] %v2034_v3  ;;  %2615 = vst [vmem:[#allocation61_spill] sm:$0xff] %v2039_v12  ;;  %v372_v8 = vand.u32 2147483647, %v2029_v4  ;;  %v2046_v49 = vmul.f32 0.70710677, %v2037_v62  ;;  %v2048_v29 = vpop.eup %1491  ;;  %1509 = vpow2.f32 %v869_v38  ;;  %v2051_v12 = vadd.f32 %v272_v20, %v1710_v22 }
 0x152   :  { %v871_v28 = vmul.f32 1.442695, %v817_v30  ;;  %v819_v3 = vmul.f32 %v787_v34, %v371_v5  ;;  %v2053_v55 = vpop.eup %1493  ;;  %v434_v48 = vadd.f32 1.0, %v402_v61  ;;  %v2057_v4 = vmul.f32 0.5, %v1921_v45 }
 0x153   :  { %2616 = vst [vmem:[#allocation62_spill] sm:$0xff] %v2046_v49  ;;  %2617 = vst [vmem:[#allocation63_spill] sm:$0xff] %v2051_v12  ;;  %v404_v57 = vmul.f32 0.3275911, %v372_v8  ;;  %v788_v58 = vsub.f32 0.0, %v372_v8  ;;  %1511 = vrcp.f32 %v433_v37  ;;  %v435_v5 = vadd.f32 1.0, %v403_v2  ;;  %v274_v37 = vpop.f32.mrf.mxu0 }
 0x154   :  { %2618 = vst [vmem:[#allocation64_spill] sm:$0xff] %v2053_v55  ;;  %v373_v46 = vand.u32 2147483647, %v2046_v49  ;;  %2619 = vst [vmem:[#allocation65_spill] sm:$0xff] %v2057_v4  ;;  %v873_v62 = vmul.f32 1.442695, %v818_v21  ;;  %v2062_v38 = vpop.eup %1495  ;;  %1513 = vpow2.f32 %v871_v28 }
 0x155   :  { %v2060_v41 = vmul.f32 0.70710677, %v2042_v1  ;;  %v875_v30 = vmul.f32 1.442695, %v819_v3  ;;  %v820_v20 = vmul.f32 %v788_v58, %v372_v8  ;;  %v2064_v55 = vpop.eup %1497  ;;  %v2068_v45 = vmul.f32 0.70710677, %v2051_v12 }
 0x156   :  { %v789_v34 = vsub.f32 0.0, %v373_v46  ;;  %2621 = vst [vmem:[#allocation67_spill] sm:$0xff] %v2064_v55  ;;  %v405_v61 = vmul.f32 0.3275911, %v373_v46  ;;  %v2071_v21 = vmul.f32 0.5, %v1950_v6  ;;  %1515 = vrcp.f32 %v434_v48 }
 0x157   :  { %2620 = vst [vmem:[#allocation66_spill] sm:$0xff] %v2060_v41  ;;  %v374_v49 = vand.u32 2147483647, %v2060_v41  ;;  %2622 = vst [vmem:[#allocation68_spill] sm:$0xff] %v2068_v45  ;;  %v436_v4 = vadd.f32 1.0, %v404_v57  ;;  %1517 = vpow2.f32 %v873_v62  ;;  %v2083_v48 = vmul.f32 0.5, %v1955_v13 }
 0x158   :  { %2623 = vst [vmem:[#allocation69_spill] sm:$0xff] %v2071_v21  ;;  %v821_v39 = vmul.f32 %v789_v34, %v373_v46  ;;  %v2073_v2 = vpop.eup %1499  ;;  %v877_v3 = vmul.f32 1.442695, %v820_v20  ;;  %v375_v28 = vand.u32 2147483647, %v2068_v45  ;;  %1519 = vrcp.f32 %v435_v5  ;;  %v278_v46 = vpop.f32.mrf.mxu0 }
 0x159   :  { %v790_v8 = vsub.f32 0.0, %v374_v49  ;;  %v2076_v58 = vpop.eup %1501  ;;  %v406_v41 = vmul.f32 0.3275911, %v374_v49  ;;  %v476_v12 = vmul.f32 1.0614054, %v1813_v15  ;;  %2626 = vst [vmem:[#allocation72_spill] sm:$0xff] %v2083_v48  ;;  %1521 = vpow2.f32 %v875_v30 }
 0x15a   :  { %2624 = vst [vmem:[#allocation70_spill] sm:$0xff] %v2076_v58  ;;  %v475_v55 = vmul.f32 1.0614054, %v1797_v0  ;;  %v2080_v6 = vpop.eup %1503  ;;  %v2086_v57 = vmul.f32 0.5, %v1967_v51  ;;  %v437_v62 = vadd.f32 1.0, %v405_v61  ;;  %1523 = vrcp.f32 %v436_v4 }
 0x15b   :  { %2625 = vst [vmem:[#allocation71_spill] sm:$0xff] %v2080_v6  ;;  %v879_v20 = vmul.f32 1.442695, %v821_v39  ;;  %v508_v34 = vadd.f32 -1.4531521, %v476_v12  ;;  %v2088_v45 = vpop.eup %1505  ;;  %1525 = vpow2.f32 %v877_v3  ;;  %v822_v21 = vmul.f32 %v790_v8, %v374_v49 }
 0x15c   :  { %2627 = vst [vmem:[#allocation73_spill] sm:$0xff] %v2086_v57  ;;  %v507_v5 = vadd.f32 -1.4531521, %v475_v55  ;;  %v791_v58 = vsub.f32 0.0, %v375_v28  ;;  %v2091_v6 = vadd.f32 %v274_v37, %v1712_v23  ;;  %v438_v13 = vadd.f32 1.0, %v406_v41  ;;  %v280_v57 = vpop.f32.mrf.mxu0 }
 0x15d   :  { %v540_v48 = vmul.f32 %v1813_v15, %v508_v34  ;;  %v2096_v30 = vadd.f32 %v278_v46, %v1710_v22  ;;  %v2098_v4 = vpop.eup %1507  ;;  %1527 = vrcp.f32 %v437_v62  ;;  %v407_v39 = vmul.f32 0.3275911, %v375_v28 }
 0x15e   :  { %2628 = vst [vmem:[#allocation74_spill] sm:$0xff] %v2091_v6  ;;  %v539_v51 = vmul.f32 %v1797_v0, %v507_v5  ;;  %v2101_v12 = vmul.f32 0.70710677, %v2091_v6  ;;  %v478_v49 = vmul.f32 1.0614054, %v1831_v60  ;;  %v2104_v55 = vpop.eup %1509  ;;  %v2107_v41 = vmul.f32 0.5, %v2001_v26 }
 0x15f   :  { %2629 = vst [vmem:[#allocation75_spill] sm:$0xff] %v2096_v30  ;;  %1529 = vpow2.f32 %v879_v20  ;;  %v572_v61 = vadd.f32 1.4214138, %v540_v48  ;;  %v881_v3 = vmul.f32 1.442695, %v822_v21  ;;  %v823_v22 = vmul.f32 %v791_v58, %v375_v28 }
 0x160   :  { %2630 = vst [vmem:[#allocation76_spill] sm:$0xff] %v2101_v12  ;;  %2631 = vst [vmem:[#allocation77_spill] sm:$0xff] %v2107_v41  ;;  %v571_v37 = vadd.f32 1.4214138, %v539_v51  ;;  %v376_v8 = vand.u32 2147483647, %v2101_v12  ;;  %v2113_v46 = vpop.eup %1511  ;;  %1531 = vrcp.f32 %v438_v13 }
 0x161   :  { %v2111_v62 = vmul.f32 0.70710677, %v2096_v30  ;;  %v604_v34 = vmul.f32 %v1813_v15, %v572_v61  ;;  %v510_v6 = vadd.f32 -1.4531521, %v478_v49  ;;  %v439_v26 = vadd.f32 1.0, %v407_v39  ;;  %v2118_v21 = vpop.eup %1513 }
 0x162   :  { %v603_v5 = vmul.f32 %v1797_v0, %v571_v37  ;;  %v408_v41 = vmul.f32 0.3275911, %v376_v8  ;;  %v792_v20 = vsub.f32 0.0, %v376_v8  ;;  %2633 = vst [vmem:[#allocation79_spill] sm:$0xff] %v2118_v21  ;;  %v477_v30 = vmul.f32 1.0614054, %v1825_v43 }
 0x163   :  { %2632 = vst [vmem:[#allocation78_spill] sm:$0xff] %v2111_v62  ;;  %v377_v48 = vand.u32 2147483647, %v2111_v62  ;;  %v636_v28 = vadd.f32 -0.28449672, %v604_v34  ;;  %v542_v51 = vmul.f32 %v1831_v60, %v510_v6  ;;  %v2122_v12 = vpop.eup %1515  ;;  %v2125_v13 = vmul.f32 0.5, %v2004_v14 }
 0x164   :  { %v635_v58 = vadd.f32 -0.28449672, %v603_v5  ;;  %1533 = vpow2.f32 %v881_v3  ;;  %v883_v49 = vmul.f32 1.442695, %v823_v22  ;;  %v440_v39 = vadd.f32 1.0, %v408_v41  ;;  %v2127_v61 = vpop.eup %1517 }
 0x165   :  { %2634 = vst [vmem:[#allocation80_spill] sm:$0xff] %v2125_v13  ;;  %2635 = vst [vmem:[#allocation81_spill] sm:$0xff] %v2127_v61  ;;  %v668_v37 = vmul.f32 %v1813_v15, %v636_v28  ;;  %v574_v34 = vadd.f32 1.4214138, %v542_v51  ;;  %v509_v5 = vadd.f32 -1.4531521, %v477_v30  ;;  %v2131_v6 = vpop.eup %1519  ;;  %1535 = vrcp.f32 %v439_v26 }
 0x166   :  { %v667_v62 = vmul.f32 %v1797_v0, %v635_v58  ;;  %v2134_v21 = vmul.f32 0.5, %v2042_v1  ;;  %v824_v14 = vmul.f32 %v792_v20, %v376_v8  ;;  %v793_v13 = vsub.f32 0.0, %v377_v48  ;;  %v2136_v3 = vpop.eup %1521 }
 0x167   :  { %2637 = vst [vmem:[#allocation83_spill] sm:$0xff] %v2136_v3  ;;  %v700_v41 = vadd.f32 0.2548296, %v668_v37  ;;  %v606_v61 = vmul.f32 %v1831_v60, %v574_v34  ;;  %v541_v28 = vmul.f32 %v1825_v43, %v509_v5  ;;  %v2140_v58 = vpop.eup %1523  ;;  %1537 = vpow2.f32 %v883_v49 }
 0x168   :  { %2636 = vst [vmem:[#allocation82_spill] sm:$0xff] %v2134_v21  ;;  %v699_v22 = vadd.f32 0.2548296, %v667_v62  ;;  %v409_v1 = vmul.f32 0.3275911, %v377_v48  ;;  %v2145_v30 = vadd.f32 %v280_v57, %v1712_v23  ;;  %v2148_v26 = vpop.eup %1525  ;;  %1539 = vrcp.f32 %v440_v39 }
 0x169   :  { %v480_v8 = vmul.f32 1.0614054, %v1853_v42  ;;  %2639 = vst [vmem:[#allocation85_spill] sm:$0xff] %v2148_v26  ;;  %v732_v62 = vmul.f32 %v1813_v15, %v700_v41  ;;  %v638_v51 = vadd.f32 -0.28449672, %v606_v61  ;;  %v825_v34 = vmul.f32 %v793_v13, %v377_v48 }
 0x16a   :  { %2638 = vst [vmem:[#allocation84_spill] sm:$0xff] %v2145_v30  ;;  %v731_v20 = vmul.f32 %v1797_v0, %v699_v22  ;;  %v885_v37 = vmul.f32 1.442695, %v824_v14  ;;  %v573_v5 = vadd.f32 1.4214138, %v541_v28  ;;  %v2155_v21 = vpop.eup %1527  ;;  %v441_v0 = vadd.f32 1.0, %v409_v1 }
 0x16b   :  { %v2153_v49 = vmul.f32 0.70710677, %v2145_v30  ;;  %v892_v23 = vmul.f32 %v1819_v33, %v732_v62  ;;  %v670_v3 = vmul.f32 %v1831_v60, %v638_v51  ;;  %v512_v26 = vadd.f32 -1.4531521, %v480_v8 }
 0x16c   :  { %v891_v57 = vmul.f32 %v1804_v7, %v731_v20  ;;  %v2160_v15 = vpop.eup %1529  ;;  %v605_v39 = vmul.f32 %v1825_v43, %v573_v5  ;;  %v479_v13 = vmul.f32 1.0614054, %v1843_v11  ;;  %vm958_vm2 = vcmp.ge.f32.partialorder %v1738_v40, 0.0 }
 0x16d   :  { %v378_v48 = vand.u32 2147483647, %v2153_v49  ;;  %v924_v61 = vsub.f32 1.0, %v892_v23  ;;  %v702_v41 = vadd.f32 0.2548296, %v670_v3  ;;  %v544_v22 = vmul.f32 %v1853_v42, %v512_v26  ;;  %v2166_v33 = vpop.eup %1531 }
 0x16e   :  { %v923_v14 = vsub.f32 1.0, %v891_v57  ;;  %1541 = vpow2.f32 %v885_v37  ;;  %v887_v7 = vmul.f32 1.442695, %v825_v34  ;;  %v637_v28 = vadd.f32 -0.28449672, %v605_v39 }
 0x16f   :  { %v410_v8 = vmul.f32 0.3275911, %v378_v48  ;;  %v988_v1 = vsub.f32 0.0, %v924_v61  ;;  %v734_v20 = vmul.f32 %v1831_v60, %v702_v41  ;;  %v576_v51 = vadd.f32 1.4214138, %v544_v22 }
 0x170   :  { %v987_v62 = vsub.f32 0.0, %v923_v14  ;;  %1543 = vrcp.f32 %v441_v0  ;;  %v669_v5 = vmul.f32 %v1825_v43, %v637_v28  ;;  %v794_v23 = vsub.f32 0.0, %v378_v48 }
 0x171   :  { %v511_v3 = vadd.f32 -1.4531521, %v479_v13  ;;  %v2171_v57 = vpop.eup %1533  ;;  %v1020_v26 = vsel %vm956_vm1, %v924_v61, %v988_v1  ;;  %v894_v34 = vmul.f32 %v1841_v10, %v734_v20  ;;  %v608_v39 = vmul.f32 %v1853_v42, %v576_v51 }
 0x172   :  { %v1019_v37 = vsel %vm955_vm0, %v923_v14, %v987_v62  ;;  %v1052_v30 = vadd.f32 1.0, %v1020_v26  ;;  %1545 = vpow2.f32 %v887_v7  ;;  %v701_v0 = vadd.f32 0.2548296, %v669_v5  ;;  %v2179_v41 = vpop.eup %1535 }
 0x173   :  { %v1051_v60 = vadd.f32 1.0, %v1019_v37  ;;  %v926_v13 = vsub.f32 1.0, %v894_v34  ;;  %v2182_v22 = vadd.f32 1.0, %v410_v8  ;;  %v640_v32 = vadd.f32 -0.28449672, %v608_v39 }
 0x174   :  { %v543_v61 = vmul.f32 %v1843_v11, %v511_v3  ;;  %v1084_v27 = vmul.f32 %v1052_v30, %v1867_v47  ;;  %v733_v10 = vmul.f32 %v1825_v43, %v701_v0  ;;  %v2187_v14 = vmul.f32 %v794_v23, %v378_v48  ;;  %v2190_v7 = vpop.eup %1537 }
 0x175   :  { %v482_v28 = vmul.f32 1.0614054, %v1889_v24  ;;  %v1083_v1 = vmul.f32 %v1051_v60, %v1846_v16  ;;  %v990_v62 = vsub.f32 0.0, %v926_v13  ;;  %v672_v20 = vmul.f32 %v1853_v42, %v640_v32  ;;  %v2194_v51 = vpop.eup %1539 }
 0x176   :  { %v575_v8 = vadd.f32 1.4214138, %v543_v61  ;;  %1218 = vmatprep.mubr.f32.mxu1 %v1084_v27  ;;  %v893_v5 = vmul.f32 %v1827_v50, %v733_v10  ;;  %v481_v43 = vmul.f32 1.0614054, %v1875_v19  ;;  %v484_v30 = vmul.f32 1.0614054, %v1914_v17 }
 0x177   :  { %v514_v47 = vadd.f32 -1.4531521, %v482_v28  ;;  %1219 = vmatmul.mubr.f32.vlgmr.msra.gmra.mxu1 %v1083_v1  ;;  %v1022_v48 = vsel %vm958_vm2, %v926_v13, %v990_v62  ;;  %v704_v23 = vadd.f32 0.2548296, %v672_v20  ;;  %v483_v3 = vmul.f32 1.0614054, %v1902_v54 }
 0x178   :  { %v607_v16 = vmul.f32 %v1843_v11, %v575_v8  ;;  %vm960_vm4 = vcmp.ge.f32.partialorder %v1753_v56, 0.0  ;;  %v1054_v26 = vadd.f32 1.0, %v1022_v48  ;;  %v925_v37 = vsub.f32 1.0, %v893_v5 }
 0x179   :  { %v546_v50 = vmul.f32 %v1889_v24, %v514_v47  ;;  %v513_v34 = vadd.f32 -1.4531521, %v481_v43  ;;  %v736_v39 = vmul.f32 %v1853_v42, %v704_v23  ;;  %v516_v0 = vadd.f32 -1.4531521, %v484_v30  ;;  %v2640_v23 = vld [vmem:[#allocation12_spill] sm:$0xff] }
 0x17a   :  { %v639_v60 = vadd.f32 -0.28449672, %v607_v16  ;;  %v515_v32 = vadd.f32 -1.4531521, %v483_v3  ;;  %v1086_v40 = vmul.f32 %v1054_v26, %v1892_v25  ;;  %v989_v13 = vsub.f32 0.0, %v925_v37 }
 0x17b   :  { %v578_v61 = vadd.f32 1.4214138, %v546_v50  ;;  %v545_v27 = vmul.f32 %v1875_v19, %v513_v34  ;;  %v2208_v10 = vpop.eup %1541  ;;  %v896_v28 = vmul.f32 %v1869_v52, %v736_v39  ;;  %v548_v62 = vmul.f32 %v1914_v17, %v516_v0 }
 0x17c   :  { %v671_v1 = vmul.f32 %v1843_v11, %v639_v60  ;;  %v547_v20 = vmul.f32 %v1902_v54, %v515_v32  ;;  %1223 = vmatprep.mubr.f32.mxu1 %v1086_v40  ;;  %v1021_v42 = vsel %vm957_vm3, %v925_v37, %v989_v13  ;;  %v486_v5 = vmul.f32 1.0614054, %v1952_v18  ;;  %v2641_v37 = vld [vmem:[#allocation24_spill] sm:$0xff] }
 0x17d   :  { %v610_v25 = vmul.f32 %v1889_v24, %v578_v61  ;;  %v577_v8 = vadd.f32 1.4214138, %v545_v27  ;;  %v2218_v47 = vpop.eup %1543  ;;  %v1053_v43 = vadd.f32 1.0, %v1021_v42  ;;  %v928_v30 = vsub.f32 1.0, %v896_v28  ;;  %v2642_v28 = vld [vmem:[#allocation22_spill] sm:$0xff] }
 0x17e   :  { %v703_v52 = vadd.f32 0.2548296, %v671_v1  ;;  %v580_v48 = vadd.f32 1.4214138, %v548_v62  ;;  %vm959_vm5 = vcmp.ge.f32.partialorder %v2640_v23, 0.0  ;;  %1547 = vrcp.f32 %v2182_v22 }
 0x17f   :  { %v642_v16 = vadd.f32 -0.28449672, %v610_v25  ;;  %v609_v3 = vmul.f32 %v1875_v19, %v577_v8  ;;  %v579_v26 = vadd.f32 1.4214138, %v547_v20  ;;  %v518_v50 = vadd.f32 -1.4531521, %v486_v5  ;;  %v2222_v36 = vpop.eup %1545 }
 0x180   :  { %v1085_v34 = vmul.f32 %v1053_v43, %v2641_v37  ;;  %v992_v39 = vsub.f32 0.0, %v928_v30  ;;  %v735_v60 = vmul.f32 %v1843_v11, %v703_v52  ;;  %v612_v0 = vmul.f32 %v1914_v17, %v580_v48  ;;  %v2643_v5 = vld [vmem:[#allocation14_spill] sm:$0xff] }
 0x181   :  { %v674_v32 = vmul.f32 %v1889_v24, %v642_v16  ;;  %v641_v40 = vadd.f32 -0.28449672, %v609_v3  ;;  %v611_v13 = vmul.f32 %v1902_v54, %v579_v26  ;;  %v550_v61 = vmul.f32 %v1952_v18, %v518_v50  ;;  %v2644_v50 = vld [vmem:[#allocation13_spill] sm:$0xff] }
 0x182   :  { %1224 = vmatmul.mubr.f32.gmra.mxu1 %v1085_v34  ;;  %v1024_v27 = vsel %vm960_vm4, %v928_v30, %v992_v39  ;;  %v895_v1 = vmul.f32 %v2642_v28, %v735_v60  ;;  %v644_v62 = vadd.f32 -0.28449672, %v612_v0  ;;  %v485_v20 = vmul.f32 1.0614054, %v1934_v35  ;;  %v2645_v0 = vld [vmem:[#allocation16_spill] sm:$0xff] }
 0x183   :  { %v1056_v42 = vadd.f32 1.0, %v1024_v27  ;;  %v706_v11 = vadd.f32 0.2548296, %v674_v32  ;;  %v673_v25 = vmul.f32 %v1875_v19, %v641_v40  ;;  %v643_v8 = vadd.f32 -0.28449672, %v611_v13  ;;  %v2646_v32 = vld [vmem:[#allocation28_spill] sm:$0xff] }
 0x184   :  { %vm962_vm6 = vcmp.ge.f32.partialorder %v2643_v5, 0.0  ;;  %v927_v43 = vsub.f32 1.0, %v895_v1  ;;  %v676_v52 = vmul.f32 %v1914_v17, %v644_v62  ;;  %v582_v48 = vadd.f32 1.4214138, %v550_v61  ;;  %v2647_v61 = vld [vmem:[#allocation15_spill] sm:$0xff] }
 0x185   :  { %v517_v16 = vadd.f32 -1.4531521, %v485_v20  ;;  %v1088_v56 = vmul.f32 %v1056_v42, %v1909_v53  ;;  %v738_v30 = vmul.f32 %v1889_v24, %v706_v11  ;;  %v705_v3 = vadd.f32 0.2548296, %v673_v25  ;;  %v2648_v11 = vld [vmem:[#allocation26_spill] sm:$0xff] }
 0x186   :  { %v675_v26 = vmul.f32 %v1902_v54, %v643_v8  ;;  %vm961_vm7 = vcmp.ge.f32.partialorder %v2644_v50, 0.0  ;;  %v991_v37 = vsub.f32 0.0, %v927_v43  ;;  %v708_v34 = vadd.f32 0.2548296, %v676_v52  ;;  %v2649_v52 = vld [vmem:[#allocation32_spill] sm:$0xff]  ;;  %v2656_v50 = vld [vmem:[#allocation17_spill] sm:$0xff] }
 0x187   :  { %v614_v39 = vmul.f32 %v1952_v18, %v582_v48  ;;  %v549_v60 = vmul.f32 %v1934_v35, %v517_v16  ;;  %vm964_vm8 = vcmp.ge.f32.partialorder %v2645_v0, 0.0  ;;  %1228 = vmatprep.mubr.f32.mxu1 %v1088_v56  ;;  %v898_v40 = vmul.f32 %v2646_v32, %v738_v30  ;;  %v2650_v30 = vld [vmem:[#allocation29_spill] sm:$0xff]  ;;  %v2652_v32 = vld [vmem:[#allocation18_spill] sm:$0xff]  ;;  %v2658_v0 = vld [vmem:[#allocation39_spill] sm:$0xff] }
 0x188   :  { %v737_v53 = vmul.f32 %v1875_v19, %v705_v3  ;;  %v707_v13 = vadd.f32 0.2548296, %v675_v26  ;;  %v488_v24 = vmul.f32 1.0614054, %v1983_v63  ;;  %vm963_vm9 = vcmp.ge.f32.partialorder %v2647_v61, 0.0 }
 0x189   :  { %v1023_v27 = vsel %vm959_vm5, %v927_v43, %v991_v37  ;;  %v740_v28 = vmul.f32 %v1914_v17, %v708_v34  ;;  %v646_v1 = vadd.f32 -0.28449672, %v614_v39  ;;  %v581_v62 = vadd.f32 1.4214138, %v549_v60  ;;  %v2651_v17 = vld [vmem:[#allocation31_spill] sm:$0xff] }
 0x18a   :  { %v1055_v20 = vadd.f32 1.0, %v1023_v27  ;;  %v930_v42 = vsub.f32 1.0, %v898_v40  ;;  %v897_v25 = vmul.f32 %v2648_v11, %v737_v53  ;;  %v739_v8 = vmul.f32 %v1902_v54, %v707_v13  ;;  %v2653_v13 = vld [vmem:[#allocation43_spill] sm:$0xff] }
 0x18b   :  { %v900_v19 = vmul.f32 %v2649_v52, %v740_v28  ;;  %v678_v48 = vmul.f32 %v1952_v18, %v646_v1  ;;  %v613_v16 = vmul.f32 %v1934_v35, %v581_v62  ;;  %v520_v56 = vadd.f32 -1.4531521, %v488_v24  ;;  %v2654_v52 = vld [vmem:[#allocation34_spill] sm:$0xff] }
 0x18c   :  { %v1087_v23 = vmul.f32 %v1055_v20, %v2650_v30  ;;  %v994_v43 = vsub.f32 0.0, %v930_v42  ;;  %v929_v3 = vsub.f32 1.0, %v897_v25  ;;  %v899_v26 = vmul.f32 %v2651_v17, %v739_v8 }
 0x18d   :  { %v932_v37 = vsub.f32 1.0, %v900_v19  ;;  %v710_v34 = vadd.f32 0.2548296, %v678_v48  ;;  %v645_v39 = vadd.f32 -0.28449672, %v613_v16  ;;  %v552_v60 = vmul.f32 %v1983_v63, %v520_v56  ;;  %v2655_v48 = vld [vmem:[#allocation41_spill] sm:$0xff] }
 0x18e   :  { %vm966_vm10 = vcmp.ge.f32.partialorder %v2652_v32, 0.0  ;;  %1229 = vmatmul.mubr.f32.gmra.mxu1 %v1087_v23  ;;  %v1026_v54 = vsel %vm962_vm6, %v930_v42, %v994_v43  ;;  %v993_v40 = vsub.f32 0.0, %v929_v3  ;;  %v931_v53 = vsub.f32 1.0, %v899_v26  ;;  %v2657_v43 = vld [vmem:[#allocation33_spill] sm:$0xff]  ;;  %v2662_v32 = vld [vmem:[#allocation46_spill] sm:$0xff] }
 0x18f   :  { %v487_v24 = vmul.f32 1.0614054, %v2653_v13  ;;  %v1058_v27 = vadd.f32 1.0, %v1026_v54  ;;  %v996_v28 = vsub.f32 0.0, %v932_v37  ;;  %v742_v1 = vmul.f32 %v1952_v18, %v710_v34  ;;  %v2659_v54 = vld [vmem:[#allocation36_spill] sm:$0xff] }
 0x190   :  { %v677_v62 = vmul.f32 %v1934_v35, %v645_v39  ;;  %v1025_v20 = vsel %vm961_vm7, %v929_v3, %v993_v40  ;;  %v995_v11 = vsub.f32 0.0, %v931_v53  ;;  %v584_v25 = vadd.f32 1.4214138, %v552_v60 }
 0x191   :  { %v519_v8 = vadd.f32 -1.4531521, %v487_v24  ;;  %v1090_v19 = vmul.f32 %v1058_v27, %v2654_v52  ;;  %v1057_v5 = vadd.f32 1.0, %v1025_v20  ;;  %v1028_v42 = vsel %vm964_vm8, %v932_v37, %v996_v28  ;;  %v2660_v28 = vld [vmem:[#allocation38_spill] sm:$0xff] }
 0x192   :  { %v902_v16 = vmul.f32 %v2655_v48, %v742_v1  ;;  %v1060_v56 = vadd.f32 1.0, %v1028_v42  ;;  %v1027_v18 = vsel %vm963_vm9, %v931_v53, %v995_v11  ;;  %v709_v30 = vadd.f32 0.2548296, %v677_v62 }
 0x193   :  { %v616_v23 = vmul.f32 %v1983_v63, %v584_v25  ;;  %vm965_vm11 = vcmp.ge.f32.partialorder %v2656_v50, 0.0  ;;  %1233 = vmatprep.mubr.f32.mxu1 %v1090_v19  ;;  %v1089_v3 = vmul.f32 %v1057_v5, %v2657_v43  ;;  %v1059_v17 = vadd.f32 1.0, %v1027_v18  ;;  %v2664_v50 = vld [vmem:[#allocation42_spill] sm:$0xff] }
 0x194   :  { %v934_v26 = vsub.f32 1.0, %v902_v16  ;;  %v551_v34 = vmul.f32 %v2653_v13, %v519_v8  ;;  %v1092_v37 = vmul.f32 %v1060_v56, %v2658_v0  ;;  %v741_v39 = vmul.f32 %v1934_v35, %v709_v30  ;;  %v2661_v16 = vld [vmem:[#allocation20_spill] sm:$0xff] }
 0x195   :  { %v648_v60 = vadd.f32 -0.28449672, %v616_v23  ;;  %v490_v61 = vmul.f32 1.0614054, %v2014_v44  ;;  %1234 = vmatmul.mubr.f32.gmra.mxu1 %v1089_v3  ;;  %v1091_v40 = vmul.f32 %v1059_v17, %v2659_v54  ;;  %v489_v27 = vmul.f32 1.0614054, %v1998_v59 }
 0x196   :  { %v998_v53 = vsub.f32 0.0, %v934_v26  ;;  %v583_v24 = vadd.f32 1.4214138, %v551_v34  ;;  %1238 = vmatprep.mubr.f32.mxu1 %v1092_v37  ;;  %v901_v1 = vmul.f32 %v2660_v28, %v741_v39  ;;  %v492_v11 = vmul.f32 1.0614054, %v2048_v29  ;;  %v2663_v28 = vld [vmem:[#allocation19_spill] sm:$0xff] }
 0x197   :  { %v680_v62 = vmul.f32 %v1983_v63, %v648_v60  ;;  %v522_v20 = vadd.f32 -1.4531521, %v490_v61  ;;  %v521_v8 = vadd.f32 -1.4531521, %v489_v27  ;;  %v491_v52 = vmul.f32 1.0614054, %v2031_v31 }
 0x198   :  { %v1030_v35 = vsel %vm966_vm10, %v934_v26, %v998_v53  ;;  %v615_v25 = vmul.f32 %v2653_v13, %v583_v24  ;;  %v933_v5 = vsub.f32 1.0, %v901_v1  ;;  %vm968_vm12 = vcmp.ge.f32.partialorder %v2661_v16, 0.0 }
 0x199   :  { %v1062_v19 = vadd.f32 1.0, %v1030_v35  ;;  %v712_v42 = vadd.f32 0.2548296, %v680_v62  ;;  %v554_v48 = vmul.f32 %v2014_v44, %v522_v20  ;;  %1239 = vmatmul.mubr.f32.gmra.mxu1 %v1091_v40  ;;  %v553_v18 = vmul.f32 %v1998_v59, %v521_v8 }
 0x19a   :  { %v647_v56 = vadd.f32 -0.28449672, %v615_v25  ;;  %v524_v30 = vadd.f32 -1.4531521, %v492_v11  ;;  %v523_v23 = vadd.f32 -1.4531521, %v491_v52 }
 0x19b   :  { %v1094_v43 = vmul.f32 %v1062_v19, %v2662_v32  ;;  %v997_v3 = vsub.f32 0.0, %v933_v5  ;;  %v744_v17 = vmul.f32 %v1983_v63, %v712_v42  ;;  %v586_v26 = vadd.f32 1.4214138, %v554_v48  ;;  %v2665_v42 = vld [vmem:[#allocation45_spill] sm:$0xff] }
 0x19c   :  { %v679_v34 = vmul.f32 %v2653_v13, %v647_v56  ;;  %v585_v0 = vadd.f32 1.4214138, %v553_v18  ;;  %v556_v37 = vmul.f32 %v2048_v29, %v524_v30  ;;  %v555_v39 = vmul.f32 %v2031_v31, %v523_v23 }
 0x19d   :  { %1243 = vmatprep.mubr.f32.mxu1 %v1094_v43  ;;  %v1029_v60 = vsel %vm965_vm11, %v933_v5, %v997_v3  ;;  %v904_v61 = vmul.f32 %v1995_v9, %v744_v17  ;;  %v618_v54 = vmul.f32 %v2014_v44, %v586_v26  ;;  %v494_v40 = vmul.f32 1.0614054, %v2073_v2  ;;  %v2666_v43 = vld [vmem:[#allocation23_spill] sm:$0xff] }
 0x19e   :  { %v1061_v53 = vadd.f32 1.0, %v1029_v60  ;;  %v711_v63 = vadd.f32 0.2548296, %v679_v34  ;;  %v617_v24 = vmul.f32 %v1998_v59, %v585_v0  ;;  %v588_v27 = vadd.f32 1.4214138, %v556_v37  ;;  %v2667_v0 = vld [vmem:[#allocation21_spill] sm:$0xff] }
 0x19f   :  { %vm967_vm13 = vcmp.ge.f32.partialorder %v2663_v28, 0.0  ;;  %v936_v1 = vsub.f32 1.0, %v904_v61  ;;  %v650_v62 = vadd.f32 -0.28449672, %v618_v54  ;;  %v587_v20 = vadd.f32 1.4214138, %v555_v39 }
 0x1a0   :  { %v1093_v11 = vmul.f32 %v1061_v53, %v2664_v50  ;;  %v743_v9 = vmul.f32 %v2653_v13, %v711_v63  ;;  %v649_v35 = vadd.f32 -0.28449672, %v617_v24  ;;  %v620_v25 = vmul.f32 %v2048_v29, %v588_v27  ;;  %v2668_v61 = vld [vmem:[#allocation49_spill] sm:$0xff]  ;;  %v2669_v24 = vld [vmem:[#allocation27_spill] sm:$0xff] }
 0x1a1   :  { %v1000_v8 = vsub.f32 0.0, %v936_v1  ;;  %v682_v52 = vmul.f32 %v2014_v44, %v650_v62  ;;  %v619_v19 = vmul.f32 %v2031_v31, %v587_v20  ;;  %v526_v5 = vadd.f32 -1.4531521, %v494_v40  ;;  %v2670_v27 = vld [vmem:[#allocation55_spill] sm:$0xff] }
 0x1a2   :  { %1244 = vmatmul.mubr.f32.gmra.mxu1 %v1093_v11  ;;  %v903_v48 = vmul.f32 %v2665_v42, %v743_v9  ;;  %v681_v22 = vmul.f32 %v1998_v59, %v649_v35  ;;  %v652_v56 = vadd.f32 -0.28449672, %v620_v25  ;;  %v493_v18 = vmul.f32 1.0614054, %v2062_v38  ;;  %v2672_v9 = vld [vmem:[#allocation51_spill] sm:$0xff] }
 0x1a3   :  { %v1032_v13 = vsel %vm968_vm12, %v936_v1, %v1000_v8  ;;  %v714_v30 = vadd.f32 0.2548296, %v682_v52  ;;  %v651_v23 = vadd.f32 -0.28449672, %v619_v19  ;;  %v558_v32 = vmul.f32 %v2073_v2, %v526_v5 }
 0x1a4   :  { %vm970_vm14 = vcmp.ge.f32.partialorder %v2666_v43, 0.0  ;;  %v1064_v3 = vadd.f32 1.0, %v1032_v13  ;;  %v935_v17 = vsub.f32 1.0, %v903_v48  ;;  %v713_v26 = vadd.f32 0.2548296, %v681_v22  ;;  %v2673_v48 = vld [vmem:[#allocation64_spill] sm:$0xff] }
 0x1a5   :  { %v684_v34 = vmul.f32 %v2048_v29, %v652_v56  ;;  %vm969_vm15 = vcmp.ge.f32.partialorder %v2667_v0, 0.0  ;;  %v746_v37 = vmul.f32 %v2014_v44, %v714_v30  ;;  %v683_v39 = vmul.f32 %v2031_v31, %v651_v23  ;;  %v2671_v44 = vld [vmem:[#allocation25_spill] sm:$0xff]  ;;  %v2674_v13 = vld [vmem:[#allocation47_spill] sm:$0xff] }
 0x1a6   :  { %v590_v60 = vadd.f32 1.4214138, %v558_v32  ;;  %v525_v16 = vadd.f32 -1.4531521, %v493_v18  ;;  %v1096_v54 = vmul.f32 %v1064_v3, %v2668_v61  ;;  %v999_v40 = vsub.f32 0.0, %v935_v17  ;;  %v2675_v23 = vld [vmem:[#allocation61_spill] sm:$0xff] }
 0x1a7   :  { %v745_v53 = vmul.f32 %v1998_v59, %v713_v26  ;;  %v716_v63 = vadd.f32 0.2548296, %v684_v34  ;;  %vm972_vm0 = vcmp.ge.f32.partialorder %v2669_v24, 0.0  ;;  %v906_v1 = vmul.f32 %v2670_v27, %v746_v37  ;;  %v2681_v24 = vld [vmem:[#allocation30_spill] sm:$0xff] }
 0x1a8   :  { %v715_v62 = vadd.f32 0.2548296, %v683_v39  ;;  %v622_v20 = vmul.f32 %v2073_v2, %v590_v60  ;;  %v557_v50 = vmul.f32 %v2062_v38, %v525_v16  ;;  %vm971_vm1 = vcmp.ge.f32.partialorder %v2671_v44, 0.0  ;;  %1248 = vmatprep.mubr.f32.mxu1 %v1096_v54  ;;  %v2676_v16 = vld [vmem:[#allocation71_spill] sm:$0xff] }
 0x1a9   :  { %v1031_v11 = vsel %vm967_vm13, %v935_v17, %v999_v40  ;;  %v905_v35 = vmul.f32 %v2672_v9, %v745_v53  ;;  %v748_v59 = vmul.f32 %v2048_v29, %v716_v63  ;;  %v496_v25 = vmul.f32 1.0614054, %v2098_v4  ;;  %v2338_v29 = vpop.eup %1547  ;;  %v2677_v54 = vld [vmem:[#allocation35_spill] sm:$0xff] }
 0x1aa   :  { %v1063_v8 = vadd.f32 1.0, %v1031_v11  ;;  %v938_v52 = vsub.f32 1.0, %v906_v1  ;;  %v747_v19 = vmul.f32 %v2031_v31, %v715_v62  ;;  %v654_v5 = vadd.f32 -0.28449672, %v622_v20  ;;  %v2678_v11 = vld [vmem:[#allocation52_spill] sm:$0xff] }
 0x1ab   :  { %v937_v42 = vsub.f32 1.0, %v905_v35  ;;  %v908_v22 = vmul.f32 %v2673_v48, %v748_v59  ;;  %v589_v56 = vadd.f32 1.4214138, %v557_v50  ;;  %v528_v18 = vadd.f32 -1.4531521, %v496_v25  ;;  %v2679_v25 = vld [vmem:[#allocation50_spill] sm:$0xff] }
 0x1ac   :  { %v1095_v30 = vmul.f32 %v1063_v8, %v2674_v13  ;;  %v1002_v28 = vsub.f32 0.0, %v938_v52  ;;  %v907_v32 = vmul.f32 %v2675_v23, %v747_v19  ;;  %v686_v3 = vmul.f32 %v2073_v2, %v654_v5  ;;  %v2680_v19 = vld [vmem:[#allocation70_spill] sm:$0xff] }
 0x1ad   :  { %v1001_v17 = vsub.f32 0.0, %v937_v42  ;;  %v940_v26 = vsub.f32 1.0, %v908_v22  ;;  %v621_v34 = vmul.f32 %v2062_v38, %v589_v56  ;;  %v560_v31 = vmul.f32 %v2098_v4, %v528_v18  ;;  %v2682_v56 = vld [vmem:[#allocation56_spill] sm:$0xff] }
 0x1ae   :  { %1249 = vmatmul.mubr.f32.gmra.mxu1 %v1095_v30  ;;  %v1034_v37 = vsel %vm970_vm14, %v938_v52, %v1002_v28  ;;  %v939_v39 = vsub.f32 1.0, %v907_v32  ;;  %v718_v60 = vadd.f32 0.2548296, %v686_v3  ;;  %v495_v61 = vmul.f32 1.0614054, %v2676_v16 }
 0x1af   :  { %vm974_vm2 = vcmp.ge.f32.partialorder %v2677_v54, 0.0  ;;  %v1066_v40 = vadd.f32 1.0, %v1034_v37  ;;  %v1033_v53 = vsel %vm969_vm15, %v937_v42, %v1001_v17  ;;  %v1004_v63 = vsub.f32 0.0, %v940_v26  ;;  %v2683_v17 = vld [vmem:[#allocation53_spill] sm:$0xff] }
 0x1b0   :  { %v653_v27 = vadd.f32 -0.28449672, %v621_v34  ;;  %v1065_v1 = vadd.f32 1.0, %v1033_v53  ;;  %v1003_v62 = vsub.f32 0.0, %v939_v39  ;;  %v750_v20 = vmul.f32 %v2073_v2, %v718_v60 }
 0x1b1   :  { %v592_v50 = vadd.f32 1.4214138, %v560_v31  ;;  %v1098_v43 = vmul.f32 %v1066_v40, %v2678_v11  ;;  %v1036_v9 = vsel %vm972_vm0, %v940_v26, %v1004_v63  ;;  %v527_v59 = vadd.f32 -1.4531521, %v495_v61  ;;  %v2685_v11 = vld [vmem:[#allocation40_spill] sm:$0xff] }
 0x1b2   :  { %v685_v35 = vmul.f32 %v2062_v38, %v653_v27  ;;  %v1097_v8 = vmul.f32 %v1065_v1, %v2679_v25  ;;  %v1068_v52 = vadd.f32 1.0, %v1036_v9  ;;  %v1035_v0 = vsel %vm971_vm1, %v939_v39, %v1003_v62  ;;  %v2684_v39 = vld [vmem:[#allocation67_spill] sm:$0xff] }
 0x1b3   :  { %v910_v5 = vmul.f32 %v2680_v19, %v750_v20  ;;  %1253 = vmatprep.mubr.f32.mxu1 %v1098_v43  ;;  %v1067_v42 = vadd.f32 1.0, %v1035_v0  ;;  %v624_v48 = vmul.f32 %v2098_v4, %v592_v50  ;;  %v559_v22 = vmul.f32 %v2676_v16, %v527_v59  ;;  %v2686_v59 = vld [vmem:[#allocation59_spill] sm:$0xff] }
 0x1b4   :  { %v717_v2 = vadd.f32 0.2548296, %v685_v35  ;;  %vm973_vm3 = vcmp.ge.f32.partialorder %v2681_v24, 0.0  ;;  %1254 = vmatmul.mubr.f32.gmra.mxu1 %v1097_v8  ;;  %v1100_v18 = vmul.f32 %v1068_v52, %v2682_v56  ;;  %v498_v30 = vmul.f32 1.0614054, %v2122_v12 }
 0x1b5   :  { %v942_v13 = vsub.f32 1.0, %v910_v5  ;;  %v497_v44 = vmul.f32 1.0614054, %v2113_v46  ;;  %v889_v28 = vmul.f32 1.442695, %v2187_v14  ;;  %v1099_v26 = vmul.f32 %v1067_v42, %v2683_v17  ;;  %v2688_v17 = vld [vmem:[#allocation57_spill] sm:$0xff] }
 0x1b6   :  { %v749_v23 = vmul.f32 %v2062_v38, %v717_v2  ;;  %v656_v32 = vadd.f32 -0.28449672, %v624_v48  ;;  %v591_v3 = vadd.f32 1.4214138, %v559_v22  ;;  %1258 = vmatprep.mubr.f32.mxu1 %v1100_v18  ;;  %v530_v31 = vadd.f32 -1.4531521, %v498_v30 }
 0x1b7   :  { %v1006_v34 = vsub.f32 0.0, %v942_v13  ;;  %v529_v37 = vadd.f32 -1.4531521, %v497_v44  ;;  %v500_v53 = vmul.f32 1.0614054, %v2140_v58  ;;  %vm976_vm4 = vcmp.ge.f32.partialorder %v2685_v11, 0.0 }
 0x1b8   :  { %v909_v60 = vmul.f32 %v2684_v39, %v749_v23  ;;  %v688_v61 = vmul.f32 %v2098_v4, %v656_v32  ;;  %v623_v40 = vmul.f32 %v2676_v16, %v591_v3  ;;  %1259 = vmatmul.mubr.f32.gmra.mxu1 %v1099_v26  ;;  %v562_v14 = vmul.f32 %v2122_v12, %v530_v31  ;;  %v2687_v18 = vld [vmem:[#allocation37_spill] sm:$0xff] }
 0x1b9   :  { %v1038_v38 = vsel %vm974_vm2, %v942_v13, %v1006_v34  ;;  %v561_v63 = vmul.f32 %v2113_v46, %v529_v37  ;;  %v499_v27 = vmul.f32 1.0614054, %v2131_v6  ;;  %1549 = vpow2.f32 %v889_v28 }
 0x1ba   :  { %v1070_v1 = vadd.f32 1.0, %v1038_v38  ;;  %v941_v62 = vsub.f32 1.0, %v909_v60  ;;  %v720_v20 = vadd.f32 0.2548296, %v688_v61  ;;  %v655_v50 = vadd.f32 -0.28449672, %v623_v40 }
 0x1bb   :  { %v594_v43 = vadd.f32 1.4214138, %v562_v14  ;;  %v593_v9 = vadd.f32 1.4214138, %v561_v63  ;;  %v532_v35 = vadd.f32 -1.4531521, %v500_v53 }
 0x1bc   :  { %v1102_v25 = vmul.f32 %v1070_v1, %v2686_v59  ;;  %v1005_v54 = vsub.f32 0.0, %v941_v62  ;;  %v752_v8 = vmul.f32 %v2098_v4, %v720_v20  ;;  %v687_v52 = vmul.f32 %v2676_v16, %v655_v50  ;;  %v2689_v38 = vld [vmem:[#allocation44_spill] sm:$0xff] }
 0x1bd   :  { %v626_v0 = vmul.f32 %v2122_v12, %v594_v43  ;;  %v625_v19 = vmul.f32 %v2113_v46, %v593_v9  ;;  %v564_v5 = vmul.f32 %v2140_v58, %v532_v35  ;;  %v531_v42 = vadd.f32 -1.4531521, %v499_v27  ;;  %v2690_v14 = vld [vmem:[#allocation48_spill] sm:$0xff] }
 0x1be   :  { %1263 = vmatprep.mubr.f32.mxu1 %v1102_v25  ;;  %v1037_v2 = vsel %vm973_vm3, %v941_v62, %v1005_v54  ;;  %v912_v48 = vmul.f32 %v2104_v55, %v752_v8  ;;  %v719_v22 = vadd.f32 0.2548296, %v687_v52  ;;  %v502_v56 = vmul.f32 1.0614054, %v2166_v33  ;;  %v2691_v54 = vld [vmem:[#allocation69_spill] sm:$0xff] }
 0x1bf   :  { %vm975_vm5 = vcmp.ge.f32.partialorder %v2687_v18, 0.0  ;;  %v1069_v4 = vadd.f32 1.0, %v1037_v2  ;;  %v658_v13 = vadd.f32 -0.28449672, %v626_v0  ;;  %v657_v30 = vadd.f32 -0.28449672, %v625_v19 }
 0x1c0   :  { %v563_v44 = vmul.f32 %v2131_v6, %v531_v42  ;;  %v944_v28 = vsub.f32 1.0, %v912_v48  ;;  %v751_v23 = vmul.f32 %v2676_v16, %v719_v22  ;;  %v596_v32 = vadd.f32 1.4214138, %v564_v5  ;;  %v2692_v52 = vld [vmem:[#allocation81_spill] sm:$0xff]  ;;  %v2693_v0 = vld [vmem:[#allocation79_spill] sm:$0xff]  ;;  %v2694_v22 = vld [vmem:[#allocation58_spill] sm:$0xff] }
 0x1c1   :  { %v534_v3 = vadd.f32 -1.4531521, %v502_v56  ;;  %v1101_v24 = vmul.f32 %v1069_v4, %v2688_v17  ;;  %v690_v26 = vmul.f32 %v2122_v12, %v658_v13  ;;  %v689_v55 = vmul.f32 %v2113_v46, %v657_v30 }
 0x1c2   :  { %v595_v34 = vadd.f32 1.4214138, %v563_v44  ;;  %v1008_v31 = vsub.f32 0.0, %v944_v28  ;;  %v911_v37 = vmul.f32 %v2088_v45, %v751_v23  ;;  %v628_v39 = vmul.f32 %v2140_v58, %v596_v32  ;;  %v2695_v44 = vld [vmem:[#allocation54_spill] sm:$0xff] }
 0x1c3   :  { %v566_v60 = vmul.f32 %v2166_v33, %v534_v3  ;;  %1264 = vmatmul.mubr.f32.gmra.mxu1 %v1101_v24  ;;  %v722_v61 = vadd.f32 0.2548296, %v690_v26  ;;  %v721_v40 = vadd.f32 0.2548296, %v689_v55  ;;  %v501_v53 = vmul.f32 1.0614054, %v2155_v21 }
 0x1c4   :  { %v627_v16 = vmul.f32 %v2131_v6, %v595_v34  ;;  %vm977_vm6 = vcmp.ge.f32.partialorder %v2689_v38, 0.0  ;;  %vm978_vm7 = vcmp.ge.f32.partialorder %v2690_v14, 0.0  ;;  %v1040_v63 = vsel %vm976_vm4, %v944_v28, %v1008_v31  ;;  %v2696_v3 = vld [vmem:[#allocation65_spill] sm:$0xff] }
 0x1c5   :  { %v943_v27 = vsub.f32 1.0, %v911_v37  ;;  %v660_v45 = vadd.f32 -0.28449672, %v628_v39  ;;  %v598_v1 = vadd.f32 1.4214138, %v566_v60  ;;  %v1072_v62 = vadd.f32 1.0, %v1040_v63 }
 0x1c6   :  { %v754_v20 = vmul.f32 %v2122_v12, %v722_v61  ;;  %v753_v50 = vmul.f32 %v2113_v46, %v721_v40  ;;  %v659_v43 = vadd.f32 -0.28449672, %v627_v16  ;;  %v533_v25 = vadd.f32 -1.4531521, %v501_v53  ;;  %v2409_v42 = vpop.eup %1549  ;;  %v2697_v34 = vld [vmem:[#allocation85_spill] sm:$0xff]  ;;  %v2698_v61 = vld [vmem:[#allocation66_spill] sm:$0xff] }
 0x1c7   :  { %v1007_v9 = vsub.f32 0.0, %v943_v27  ;;  %v692_v35 = vmul.f32 %v2140_v58, %v660_v45  ;;  %v630_v59 = vmul.f32 %v2166_v33, %v598_v1  ;;  %v1104_v8 = vmul.f32 %v1072_v62, %v2691_v54  ;;  %v2699_v16 = vld [vmem:[#allocation83_spill] sm:$0xff] }
 0x1c8   :  { %v914_v11 = vmul.f32 %v2692_v52, %v754_v20  ;;  %v913_v19 = vmul.f32 %v2693_v0, %v753_v50  ;;  %v691_v5 = vmul.f32 %v2131_v6, %v659_v43  ;;  %v565_v48 = vmul.f32 %v2155_v21, %v533_v25 }
 0x1c9   :  { %v1039_v12 = vsel %vm975_vm5, %v943_v27, %v1007_v9  ;;  %v724_v46 = vadd.f32 0.2548296, %v692_v35  ;;  %v662_v2 = vadd.f32 -0.28449672, %v630_v59  ;;  %vm980_vm8 = vcmp.ge.f32.partialorder %v2694_v22, 0.0  ;;  %1268 = vmatprep.mubr.f32.mxu1 %v1104_v8  ;;  %v2700_v9 = vld [vmem:[#allocation73_spill] sm:$0xff] }
 0x1ca   :  { %v1071_v56 = vadd.f32 1.0, %v1039_v12  ;;  %v946_v4 = vsub.f32 1.0, %v914_v11  ;;  %v945_v13 = vsub.f32 1.0, %v913_v19  ;;  %v723_v30 = vadd.f32 0.2548296, %v691_v5  ;;  %v2701_v35 = vld [vmem:[#allocation72_spill] sm:$0xff] }
 0x1cb   :  { %vm979_vm9 = vcmp.ge.f32.partialorder %v2695_v44, 0.0  ;;  %v756_v28 = vmul.f32 %v2140_v58, %v724_v46  ;;  %v694_v23 = vmul.f32 %v2166_v33, %v662_v2  ;;  %v597_v32 = vadd.f32 1.4214138, %v565_v48 }
 0x1cc   :  { %v504_v18 = vmul.f32 1.0614054, %v2194_v51  ;;  %v1103_v17 = vmul.f32 %v1071_v56, %v2696_v3  ;;  %v1010_v24 = vsub.f32 0.0, %v946_v4  ;;  %v1009_v26 = vsub.f32 0.0, %v945_v13 }
 0x1cd   :  { %v755_v55 = vmul.f32 %v2131_v6, %v723_v30  ;;  %v916_v31 = vmul.f32 %v2697_v34, %v756_v28  ;;  %v726_v37 = vadd.f32 0.2548296, %v694_v23  ;;  %v629_v39 = vmul.f32 %v2155_v21, %v597_v32  ;;  %v2702_v30 = vld [vmem:[#allocation80_spill] sm:$0xff] }
 0x1ce   :  { %v536_v60 = vadd.f32 -1.4531521, %v504_v18  ;;  %vm982_vm10 = vcmp.ge.f32.partialorder %v2698_v61, 0.0  ;;  %1269 = vmatmul.mubr.f32.gmra.mxu1 %v1103_v17  ;;  %v1042_v58 = vsel %vm978_vm7, %v946_v4, %v1010_v24  ;;  %v1041_v40 = vsel %vm977_vm6, %v945_v13, %v1009_v26  ;;  %v2703_v18 = vld [vmem:[#allocation77_spill] sm:$0xff] }
 0x1cf   :  { %v915_v53 = vmul.f32 %v2699_v16, %v755_v55  ;;  %v503_v63 = vmul.f32 1.0614054, %v2179_v41  ;;  %v1074_v6 = vadd.f32 1.0, %v1042_v58  ;;  %v1073_v27 = vadd.f32 1.0, %v1041_v40 }
 0x1d0   :  { %v948_v45 = vsub.f32 1.0, %v916_v31  ;;  %v758_v1 = vmul.f32 %v2166_v33, %v726_v37  ;;  %v661_v20 = vadd.f32 -0.28449672, %v629_v39  ;;  %v568_v50 = vmul.f32 %v2194_v51, %v536_v60  ;;  %v2704_v39 = vld [vmem:[#allocation82_spill] sm:$0xff] }
 0x1d1   :  { %v947_v62 = vsub.f32 1.0, %v915_v53  ;;  %v535_v43 = vadd.f32 -1.4531521, %v503_v63  ;;  %v1106_v14 = vmul.f32 %v1074_v6, %v2700_v9  ;;  %v1105_v59 = vmul.f32 %v1073_v27, %v2701_v35  ;;  %v2705_v27 = vld [vmem:[#allocation62_spill] sm:$0xff] }
 0x1d2   :  { %v1012_v38 = vsub.f32 0.0, %v948_v45  ;;  %v918_v25 = vmul.f32 %v2171_v57, %v758_v1  ;;  %v693_v8 = vmul.f32 %v2155_v21, %v661_v20  ;;  %v600_v52 = vadd.f32 1.4214138, %v568_v50 }
 0x1d3   :  { %v1011_v54 = vsub.f32 0.0, %v947_v62  ;;  %v567_v11 = vmul.f32 %v2179_v41, %v535_v43  ;;  %1273 = vmatprep.mubr.f32.mxu1 %v1106_v14  ;;  %v506_v19 = vmul.f32 1.0614054, %v2338_v29  ;;  %v505_v5 = vmul.f32 1.0614054, %v2218_v47  ;;  %v2706_v43 = vld [vmem:[#allocation60_spill] sm:$0xff] }
 0x1d4   :  { %v1044_v33 = vsel %vm980_vm8, %v948_v45, %v1012_v38  ;;  %v950_v0 = vsub.f32 1.0, %v918_v25  ;;  %1274 = vmatmul.mubr.f32.gmra.mxu1 %v1105_v59  ;;  %v725_v46 = vadd.f32 0.2548296, %v693_v8  ;;  %v632_v2 = vmul.f32 %v2194_v51, %v600_v52 }
 0x1d5   :  { %v1076_v12 = vadd.f32 1.0, %v1044_v33  ;;  %v1043_v57 = vsel %vm979_vm9, %v947_v62, %v1011_v54  ;;  %v599_v4 = vadd.f32 1.4214138, %v567_v11  ;;  %v538_v13 = vadd.f32 -1.4531521, %v506_v19  ;;  %v2707_v33 = vld [vmem:[#allocation76_spill] sm:$0xff] }
 0x1d6   :  { %v1075_v48 = vadd.f32 1.0, %v1043_v57  ;;  %v1014_v56 = vsub.f32 0.0, %v950_v0  ;;  %v757_v28 = vmul.f32 %v2155_v21, %v725_v46  ;;  %v664_v23 = vadd.f32 -0.28449672, %v632_v2 }
 0x1d7   :  { %v1108_v22 = vmul.f32 %v1076_v12, %v2702_v30  ;;  %v537_v32 = vadd.f32 -1.4531521, %v505_v5  ;;  %v631_v44 = vmul.f32 %v2179_v41, %v599_v4  ;;  %v570_v24 = vmul.f32 %v2338_v29, %v538_v13  ;;  %v2708_v5 = vld [vmem:[#allocation74_spill] sm:$0xff]  ;;  %v2710_v30 = vld [vmem:[#allocation63_spill] sm:$0xff] }
 0x1d8   :  { %v1107_v3 = vmul.f32 %v1075_v48, %v2703_v18  ;;  %v1046_v17 = vsel %vm982_vm10, %v950_v0, %v1014_v56  ;;  %v917_v55 = vmul.f32 %v2160_v15, %v757_v28  ;;  %v696_v34 = vmul.f32 %v2194_v51, %v664_v23  ;;  %v2709_v48 = vld [vmem:[#allocation68_spill] sm:$0xff]  ;;  %v2711_v18 = vld [vmem:[#allocation78_spill] sm:$0xff] }
 0x1d9   :  { %1278 = vmatprep.mubr.f32.mxu1 %v1108_v22  ;;  %v1078_v26 = vadd.f32 1.0, %v1046_v17  ;;  %v569_v31 = vmul.f32 %v2218_v47, %v537_v32  ;;  %v663_v21 = vadd.f32 -0.28449672, %v631_v44  ;;  %v602_v37 = vadd.f32 1.4214138, %v570_v24  ;;  %v2713_v24 = vld [vmem:[#allocation75_spill] sm:$0xff] }
 0x1da   :  { %1279 = vmatmul.mubr.f32.gmra.mxu1 %v1107_v3  ;;  %v949_v58 = vsub.f32 1.0, %v917_v55  ;;  %v728_v61 = vadd.f32 0.2548296, %v696_v34  ;;  %vm981_vm11 = vcmp.ge.f32.partialorder %v2705_v27, 0.0  ;;  %v309_v9 = vmul.f32 0.5, %v2706_v43  ;;  %v2712_v3 = vld [vmem:[#allocation84_spill] sm:$0xff] }
 0x1db   :  { %v1110_v60 = vmul.f32 %v1078_v26, %v2704_v39  ;;  %v601_v40 = vadd.f32 1.4214138, %v569_v31  ;;  %v695_v16 = vmul.f32 %v2179_v41, %v663_v21  ;;  %v634_v53 = vmul.f32 %v2338_v29, %v602_v37 }
 0x1dc   :  { %v1013_v63 = vsub.f32 0.0, %v949_v58  ;;  %v760_v15 = vmul.f32 %v2194_v51, %v728_v61  ;;  %vm984_vm12 = vcmp.ge.f32.partialorder %v2707_v33, 0.0  ;;  %v312_v12 = vmul.f32 0.5, %v2708_v5 }
 0x1dd   :  { %1283 = vmatprep.mubr.f32.mxu1 %v1110_v60  ;;  %v633_v6 = vmul.f32 %v2218_v47, %v601_v40  ;;  %v727_v45 = vadd.f32 0.2548296, %v695_v16  ;;  %v666_v1 = vadd.f32 -0.28449672, %v634_v53  ;;  %vm983_vm13 = vcmp.ge.f32.partialorder %v2709_v48, 0.0 }
 0x1de   :  { %v1045_v62 = vsel %vm981_vm11, %v949_v58, %v1013_v63  ;;  %v920_v20 = vmul.f32 %v2208_v10, %v760_v15  ;;  %v311_v22 = vmul.f32 0.5, %v2710_v30  ;;  %vm986_vm14 = vcmp.ge.f32.partialorder %v2153_v49, 0.0  ;;  %v2481_v49 = vld [vmem:[%s2509_s4] ss:$0 sm:$0xff]  ;;  %s1645_s4 = smov [#allocation8]  }
 0x1df   :  { %v665_v50 = vadd.f32 -0.28449672, %v633_v6  ;;  %v1077_v14 = vadd.f32 1.0, %v1045_v62  ;;  %v759_v35 = vmul.f32 %v2179_v41, %v727_v45  ;;  %v698_v59 = vmul.f32 %v2338_v29, %v666_v1  ;;  %s1320_s12 = sshll.u32 %s1645_s4, 4  ;;  %s1321_s12 = int_to_ptr.vmem [resolvable:$true] %s1320_s12 }
 0x1e0   :  { %v952_v38 = vsub.f32 1.0, %v920_v20  ;;  %vm985_vm15 = vcmp.ge.f32.partialorder %v2711_v18, 0.0  ;;  %v314_v17 = vmul.f32 0.5, %v2712_v3  ;;  %v313_v26 = vmul.f32 0.5, %v2713_v24  ;;  %s1611_s13 = scalar_lea.vmem %s1321_s12, 2048  ;;  %p1616_p2 = scmp.lt.s32.totalorder %s1321_s12, %s1321_s12 }
 0x1e1   :  { %v697_v51 = vmul.f32 %v2218_v47, %v665_v50  ;;  %v1109_v25 = vmul.f32 %v1077_v14, %v309_v9  ;;  %v919_v54 = vmul.f32 %v2190_v7, %v759_v35  ;;  %v730_v8 = vadd.f32 0.2548296, %v698_v59  ;;  %p1612_p1 = scmp.ne.s32.totalorder %s1321_s12, %s1611_s13  ;;  %p1617_p3 = scmp.lt.s32.totalorder %s1611_s13, %s1611_s13 }
 0x1e2   :  { %v1016_v52 = vsub.f32 0.0, %v952_v38 }
 0x1e3   :  { %v729_v11 = vadd.f32 0.2548296, %v697_v51  ;;  %1284 = vmatmul.mubr.f32.gmra.mxu1 %v1109_v25  ;;  %v951_v10 = vsub.f32 1.0, %v919_v54  ;;  %v762_v0 = vmul.f32 %v2338_v29, %v730_v8  ;;  %p1618_p4 = por %p1617_p3, %p1616_p2 }
 0x1e4   :  { %v1048_v19 = vsel %vm984_vm12, %v952_v38, %v1016_v52 }
 0x1e5   :  { %v761_v41 = vmul.f32 %v2218_v47, %v729_v11  ;;  %v1080_v57 = vadd.f32 1.0, %v1048_v19  ;;  %v1015_v46 = vsub.f32 0.0, %v951_v10  ;;  %v922_v2 = vmul.f32 %v2409_v42, %v762_v0  ;;  %p1619_p5 = pnand %p1618_p4, %p1612_p1 }
 0x1e7   :  { %v921_v7 = vmul.f32 %v2222_v36, %v761_v41  ;;  %v1112_v56 = vmul.f32 %v1080_v57, %v312_v12  ;;  %v1047_v4 = vsel %vm983_vm13, %v951_v10, %v1015_v46  ;;  %v954_v13 = vsub.f32 1.0, %v922_v2 }
 0x1e8   :  { %v1079_v28 = vadd.f32 1.0, %v1047_v4 }
 0x1e9   :  { %v953_v29 = vsub.f32 1.0, %v921_v7  ;;  %1288 = vmatprep.mubr.f32.mxu1 %v1112_v56  ;;  %v1018_v23 = vsub.f32 0.0, %v954_v13 }
 0x1ea   :  { %v1111_v47 = vmul.f32 %v1079_v28, %v311_v22 }
 0x1eb   :  { %v1017_v32 = vsub.f32 0.0, %v953_v29  ;;  %v1050_v42 = vsel %vm986_vm14, %v954_v13, %v1018_v23 }
 0x1ec   :  { %1289 = vmatmul.mubr.f32.gmra.mxu1 %v1111_v47  ;;  %v1082_v36 = vadd.f32 1.0, %v1050_v42 }
 0x1ed   :  { %v1049_v44 = vsel %vm985_vm15, %v953_v29, %v1017_v32 }
 0x1ee   :  { %v1081_v55 = vadd.f32 1.0, %v1049_v44  ;;  %v1114_v34 = vmul.f32 %v1082_v36, %v314_v17 }
 0x1f0   :  { %v1113_v31 = vmul.f32 %v1081_v55, %v313_v26  ;;  %1293 = vmatprep.mubr.f32.mxu1 %v1114_v34 }
 0x1f2   :  { %1294 = vmatmul.mubr.f32.gmra.mxu1 %v1113_v31 }
 0x237   :  { %v1366_v21 = vpop.f32.mrf.mxu1 }
 0x239   :  { %v1367_v37 = vpop.f32.mrf.mxu1 }
 0x23a   :  { %v1368_v39 = vadd.f32 %v1367_v37, %v1366_v21 }
 0x23c   :  { %v1221_v60 = vadd.f32 %v1368_v39, %v2481_v49 }
 0x23e   :  { %1299 = vst [vmem:[#allocation8] sm:$0xff] %v1221_v60 }
 0x242   :  { %v1369_v58 = vpop.f32.mrf.mxu1 }
 0x244   :  { %v1370_v61 = vpop.f32.mrf.mxu1 }
 0x245   :  { %v1371_v40 = vadd.f32 %v1370_v61, %v1369_v58 }
 0x247   :  { %v1226_v16 = vadd.f32 %v1371_v40, %v2481_v49 }
 0x249   :  { %1300 = vst [vmem:[#allocation8 + $0x8] sm:$0xff] %v1226_v16 }
 0x24e   :  { %v1372_v53 = vpop.f32.mrf.mxu1 }
 0x250   :  { %v1373_v63 = vpop.f32.mrf.mxu1 }
 0x251   :  { %v1374_v15 = vadd.f32 %v1373_v63, %v1372_v53 }
 0x253   :  { %v1231_v6 = vadd.f32 %v1374_v15, %v2481_v49 }
 0x255   :  { %1301 = vst [vmem:[#allocation8 + $0x10] sm:$0xff] %v1231_v6  ;;  %v1375_v27 = vpop.f32.mrf.mxu1 }
 0x257   :  { %v1376_v45 = vpop.f32.mrf.mxu1 }
 0x258   :  { %v1377_v1 = vadd.f32 %v1376_v45, %v1375_v27 }
 0x259   :  { %v1378_v62 = vpop.f32.mrf.mxu1 }
 0x25a   :  { %v1236_v20 = vadd.f32 %v1377_v1, %v2481_v49 }
 0x25b   :  { %v1379_v50 = vpop.f32.mrf.mxu1 }
 0x25c   :  { %1302 = vst [vmem:[#allocation8 + $0x18] sm:$0xff] %v1236_v20  ;;  %v1380_v43 = vadd.f32 %v1379_v50, %v1378_v62 }
 0x25e   :  { %v1241_v9 = vadd.f32 %v1380_v43, %v2481_v49 }
 0x260   :  { %1303 = vst [vmem:[#allocation8 + $0x20] sm:$0xff] %v1241_v9 }
 0x262   :  { %v1381_v14 = vpop.f32.mrf.mxu1 }
 0x264   :  { %v1382_v35 = vpop.f32.mrf.mxu1 }
 0x265   :  { %v1383_v59 = vadd.f32 %v1382_v35, %v1381_v14 }
 0x267   :  { %v1246_v38 = vadd.f32 %v1383_v59, %v2481_v49 }
 0x269   :  { %1304 = vst [vmem:[#allocation8 + $0x28] sm:$0xff] %v1246_v38 }
 0x26e   :  { %v1384_v51 = vpop.f32.mrf.mxu1 }
 0x270   :  { %v1385_v25 = vpop.f32.mrf.mxu1 }
 0x271   :  { %v1386_v54 = vadd.f32 %v1385_v25, %v1384_v51 }
 0x273   :  { %v1251_v8 = vadd.f32 %v1386_v54, %v2481_v49 }
 0x274   :  { %v1387_v52 = vpop.f32.mrf.mxu1 }
 0x275   :  { %1305 = vst [vmem:[#allocation8 + $0x30] sm:$0xff] %v1251_v8 }
 0x276   :  { %v1388_v11 = vpop.f32.mrf.mxu1 }
 0x277   :  { %v1389_v33 = vadd.f32 %v1388_v11, %v1387_v52 }
 0x278   :  { %v1390_v10 = vpop.f32.mrf.mxu1 }
 0x279   :  { %v1256_v0 = vadd.f32 %v1389_v33, %v2481_v49 }
 0x27a   :  { %v1391_v19 = vpop.f32.mrf.mxu1 }
 0x27b   :  { %1306 = vst [vmem:[#allocation8 + $0x38] sm:$0xff] %v1256_v0  ;;  %v1392_v41 = vadd.f32 %v1391_v19, %v1390_v10 }
 0x27d   :  { %v1261_v5 = vadd.f32 %v1392_v41, %v2481_v49 }
 0x27f   :  { %1307 = vst [vmem:[#allocation8 + $0x40] sm:$0xff] %v1261_v5 }
 0x283   :  { %v1393_v12 = vpop.f32.mrf.mxu1 }
 0x285   :  { %v1394_v57 = vpop.f32.mrf.mxu1 }
 0x286   :  { %v1395_v46 = vadd.f32 %v1394_v57, %v1393_v12 }
 0x288   :  { %v1266_v2 = vadd.f32 %v1395_v46, %v2481_v49 }
 0x28a   :  { %1308 = vst [vmem:[#allocation8 + $0x48] sm:$0xff] %v1266_v2 }
 0x28e   :  { %v1396_v48 = vpop.f32.mrf.mxu1 }
 0x290   :  { %v1397_v7 = vpop.f32.mrf.mxu1 }
 0x291   :  { %v1398_v56 = vadd.f32 %v1397_v7, %v1396_v48 }
 0x293   :  { %v1271_v4 = vadd.f32 %v1398_v56, %v2481_v49 }
 0x294   :  { %v1399_v13 = vpop.f32.mrf.mxu1 }
 0x295   :  { %1309 = vst [vmem:[#allocation8 + $0x50] sm:$0xff] %v1271_v4 }
 0x296   :  { %v1400_v30 = vpop.f32.mrf.mxu1 }
 0x297   :  { %v1401_v22 = vadd.f32 %v1400_v30, %v1399_v13 }
 0x299   :  { %v1276_v28 = vadd.f32 %v1401_v22, %v2481_v49 }
 0x29a   :  { %v1402_v29 = vpop.f32.mrf.mxu1 }
 0x29b   :  { %1310 = vst [vmem:[#allocation8 + $0x58] sm:$0xff] %v1276_v28 }
 0x29c   :  { %v1403_v23 = vpop.f32.mrf.mxu1 }
 0x29d   :  { %v1404_v47 = vadd.f32 %v1403_v23, %v1402_v29 }
 0x29f   :  { %v1281_v32 = vadd.f32 %v1404_v47, %v2481_v49 }
 0x2a1   :  { %1311 = vst [vmem:[#allocation8 + $0x60] sm:$0xff] %v1281_v32 }
 0x2a3   :  { %v1405_v18 = vpop.f32.mrf.mxu1 }
 0x2a5   :  { %v1406_v42 = vpop.f32.mrf.mxu1 }
 0x2a6   :  { %v1407_v3 = vadd.f32 %v1406_v42, %v1405_v18 }
 0x2a8   :  { %v1286_v17 = vadd.f32 %v1407_v3, %v2481_v49 }
 0x2aa   :  { %1312 = vst [vmem:[#allocation8 + $0x68] sm:$0xff] %v1286_v17 }
 0x2ac   :  { %v1408_v36 = vpop.f32.mrf.mxu1 }
 0x2ae   :  { %v1409_v44 = vpop.f32.mrf.mxu1 }
 0x2af   :  { %v1410_v24 = vadd.f32 %v1409_v44, %v1408_v36 }
 0x2b1   :  { %v1291_v26 = vadd.f32 %v1410_v24, %v2481_v49 }
 0x2b2   :  { %v1411_v55 = vpop.f32.mrf.mxu1 }
 0x2b3   :  { %1313 = vst [vmem:[#allocation8 + $0x70] sm:$0xff] %v1291_v26 }
 0x2b4   :  { %v1412_v34 = vpop.f32.mrf.mxu1 }
 0x2b5   :  { %v1413_v31 = vadd.f32 %v1412_v34, %v1411_v55 }
 0x2b7   :  { %v1296_v21 = vadd.f32 %v1413_v31, %v2481_v49 }
 0x2b9   :  { %1314 = vst [vmem:[#allocation8 + $0x78] sm:$0xff] %v1296_v21 }
 0x2ba   :  { %1622 = shalt.err (!%p1619_p5)
}
 0x2bb   :  { %1326 = dma.vmem_to_hbm [thread:$0]  %s1321_s12, 2048, %s2510_s5, [#allocation4], %s1641_s28, %s1641_s28, %s1642_s29  }
 0x2bc   :  { %1635 = dma.done.wait [#allocation4], 2048  }
 0x2bd   :  { %1636 = vsyncadd [#allocation4], 4294965248 }
 0x2be   :  { %1330 = vsyncpa [#allocation3], 1 }
 0x2bf   :  { %1331 = vsyncpa [#allocation6], 1 }
 0x2c0   :  { %1332 = vsyncpa [#allocation4], 1 }

</bundles_post_ra>
